<compile_context>
chip_gen: v5e
topology: v5e:2x2
jax: 0.10.0
libtpu: 0.0.40
codegen_flags: <defaults>
</compile_context>

<pallas_src>
import functools
import math

import jax
import jax.numpy as jnp
from jax.experimental import pallas as pl
from jax.experimental.pallas import tpu as pltpu

# nn.LeakyReLU(True): first positional arg is negative_slope -> 1.0 (identity).
LEAKY_SLOPE = 1.0


# ------------------------------ fused kernel -------------------------------- #

def _decoder_layer_kernel(
    tgt_ref, mem_ref,
    sa_wq, sa_bq, sa_wk, sa_bk, sa_wv, sa_bv, sa_wo, sa_bo,
    ca_wq, ca_bq, ca_wk, ca_bk, ca_wv, ca_bv, ca_wo, ca_bo,
    w1_ref, b1_ref, w2_ref, b2_ref,
    o_ref,
    heads_ref,
    *, nhead, scale, compute_dtype):
    """One block of `nb` batch elements per grid step; all data stays in VMEM."""
    nb, L, E = tgt_ref.shape
    S = mem_ref.shape[1]
    Hd = E // nhead
    cd = compute_dtype

    def mm(a, w_ref):
        # activation x resident weight (weight already compute_dtype), f32 acc
        return jnp.dot(a.astype(cd), w_ref[...],
                       preferred_element_type=jnp.float32)

    def mha(q_src, kv_src, kv_rows, wq, bq, wk, bk, wv, bv, wo, bo):
        """Multi-head attention.  q_src: (nb*L, E); kv_src: (nb*kv_rows, E)."""
        # row-batched projections (one matmul each, all batch rows folded)
        q = mm(q_src, wq) + bq[...]
        k = mm(kv_src, wk) + bk[...]
        v = mm(kv_src, wv) + bv[...]
        qs = (q * scale).astype(cd)          # PyTorch scales q after projection
        kc = k.astype(cd)
        vc = v.astype(cd)
        for b in range(nb):                  # static, small trip counts
            qb = qs[b * L:(b + 1) * L, :]                      # (L, E)
            kbT = kc[b * kv_rows:(b + 1) * kv_rows, :].T       # (E, S) 1 transpose
            vb = vc[b * kv_rows:(b + 1) * kv_rows, :]          # (S, E)
            for h in range(nhead):
                sl = slice(h * Hd, (h + 1) * Hd)
                # head slice of K^T is sublane-aligned (offset h*Hd, Hd=E/nhead)
                s = jnp.dot(qb[:, sl], kbT[sl, :],
                            preferred_element_type=jnp.float32)        # (L, S)
                s = s - jnp.max(s, axis=-1, keepdims=True)
                p = jnp.exp(s)
                p = p * pl.reciprocal(jnp.sum(p, axis=-1, keepdims=True),
                                      approx=False)
                oh = jnp.dot(p.astype(cd), vb[:, sl],
                             preferred_element_type=jnp.float32)       # (L, Hd)
                # place this head's output at its column offset (concat layout)
                heads_ref[b * L:(b + 1) * L, sl] = oh
        # single fused out-projection over all rows and all heads
        return mm(heads_ref[...], wo) + bo[...]

    x = tgt_ref[...].reshape(nb * L, E)      # fold batch into the row dim
    mem = mem_ref[...].reshape(nb * S, E)

    # ---- self-attention + residual ------------------------------------------
    x = x + mha(x, x, L, sa_wq, sa_bq, sa_wk, sa_bk, sa_wv, sa_bv, sa_wo, sa_bo)

    # ---- cross-attention (query = tgt, key/value = memory) + residual -------
    x = x + mha(x, mem, S, ca_wq, ca_bq, ca_wk, ca_bk, ca_wv, ca_bv,
                ca_wo, ca_bo)

    # ---- feed-forward + residual ---------------------------------------------
    h = mm(x, w1_ref) + b1_ref[...]
    if LEAKY_SLOPE != 1.0:   # LeakyReLU(negative_slope=1.0) is the identity
        h = jnp.where(h >= 0, h, LEAKY_SLOPE * h)
    x = x + mm(h, w2_ref) + b2_ref[...]

    # TODO(synk): v5e lane-dense store (last dim >=128, e.g. (nb, L*E)) would
    # avoid masked vst at E=32; skipped since the in-kernel relayout costs
    # roughly the same at these sizes.
    o_ref[...] = x.reshape(nb, L, E)


# ------------------------------- wrapper ------------------------------------ #

def _pick_batch_block(N, L, target_rows=128):
    """Batch elements per grid step: enough rows (~target_rows) to feed the MXU
    but keep >= 2 grid steps when N > 1 (both v7x TensorCores busy); must
    divide N exactly."""
    cap = max(1, target_rows // max(L, 1))
    if N > 1:
        cap = min(cap, N // 2)
    cap = max(1, min(cap, N))
    nb = 1
    for d in range(1, cap + 1):
        if N % d == 0:
            nb = d
    return nb


def transformer_decoder_layer(tgt, memory, params, nhead,
                              compute_dtype=jnp.float32):
    """TranAD TransformerDecoderLayer.forward (dropout=0, no masks).

    tgt: (L, N, E), memory: (S, N, E).  Returns (L, N, E) float32.
    compute_dtype=jnp.bfloat16 enables the MXU-native path on v6e/v7x
    (~1e-3-level deviation from the f32 PyTorch reference).
    """
    L, N, E = tgt.shape
    S = memory.shape[0]
    Hd = E // nhead
    scale = 1.0 / math.sqrt(Hd)
    cd = compute_dtype

    sa = params["self_attn"]
    ca = params["multihead_attn"]

    # One-time weight splits / transposes (tiny, constant-folded by XLA).
    # Keep these out of the per-call path if params ever become traced args.
    def split_mha(p):
        w, b = p["in_proj_weight"], p["in_proj_bias"]
        return (w[:E].T.astype(cd), b[:E].reshape(1, E).astype(jnp.float32),
                w[E:2 * E].T.astype(cd),
                b[E:2 * E].reshape(1, E).astype(jnp.float32),
                w[2 * E:].T.astype(cd),
                b[2 * E:].reshape(1, E).astype(jnp.float32),
                p["out_proj_weight"].T.astype(cd),
                p["out_proj_bias"].reshape(1, E).astype(jnp.float32))

    sa_w = split_mha(sa)
    ca_w = split_mha(ca)
    w1 = params["linear1_w"].T.astype(cd)                       # (E, dff)
    b1 = params["linear1_b"].reshape(1, -1).astype(jnp.float32)
    w2 = params["linear2_w"].T.astype(cd)                       # (dff, E)
    b2 = params["linear2_b"].reshape(1, E).astype(jnp.float32)

    # Batch-major layout so each grid step reads a lane-dense (nb, L, E) slab.
    # (For E >= 128 the HBM transposes could be dropped via a squeezed
    # (L, 1, E) BlockSpec; at E=32 the transpose is the better trade.)
    tgt_b = tgt.transpose(1, 0, 2).astype(jnp.float32)      # (N, L, E)
    mem_b = memory.transpose(1, 0, 2).astype(jnp.float32)   # (N, S, E)

    nb = _pick_batch_block(N, L)
    grid = (N // nb,)

    kernel = functools.partial(_decoder_layer_kernel, nhead=nhead, scale=scale,
                               compute_dtype=cd)

    # Weights / biases: whole-array, single-buffered VMEM residents.
    wspec = pl.BlockSpec(memory_space=pltpu.MemorySpace.VMEM)

    out = pl.pallas_call(
        kernel,
        out_shape=jax.ShapeDtypeStruct((N, L, E), jnp.float32),
        grid=grid,
        in_specs=[
            pl.BlockSpec((nb, L, E), lambda n: (n, 0, 0)),   # tgt block
            pl.BlockSpec((nb, S, E), lambda n: (n, 0, 0)),   # memory block
        ] + [wspec] * 20,
        out_specs=pl.BlockSpec((nb, L, E), lambda n: (n, 0, 0)),
        scratch_shapes=[pltpu.VMEM((nb * L, E), jnp.float32)],  # head-concat buf
        # TODO(synk): for large L add a second "parallel" L-tile axis and set
        # vmem_limit_bytes explicitly, sizing the tile for v7x's 64 MiB VMEM.
        compiler_params=pltpu.CompilerParams(
            dimension_semantics=("parallel",)),
    )(tgt_b, mem_b, *sa_w, *ca_w, w1, b1, w2, b2)

    return out.transpose(1, 0, 2)       # back to (L, N, E)


# ------------------------------ param init ---------------------------------- #

def init_params(key, d_model, nhead, dim_feedforward):
    def dense(k, shape, fan_in):
        bound = 1.0 / math.sqrt(fan_in)
        return jax.random.uniform(k, shape, jnp.float32, -bound, bound)

    ks = jax.random.split(key, 12)

    def mha_params(k0, k1, k2, k3):
        return {
            "in_proj_weight": dense(k0, (3 * d_model, d_model), d_model),
            "in_proj_bias": dense(k1, (3 * d_model,), d_model),
            "out_proj_weight": dense(k2, (d_model, d_model), d_model),
            "out_proj_bias": dense(k3, (d_model,), d_model),
        }

    return {
        "self_attn": mha_params(ks[0], ks[1], ks[2], ks[3]),
        "multihead_attn": mha_params(ks[4], ks[5], ks[6], ks[7]),
        "linear1_w": dense(ks[8], (dim_feedforward, d_model), d_model),
        "linear1_b": dense(ks[9], (dim_feedforward,), d_model),
        "linear2_w": dense(ks[10], (d_model, dim_feedforward), dim_feedforward),
        "linear2_b": dense(ks[11], (d_model,), dim_feedforward),
    }


# --------------------------- pure-JAX reference ------------------------------ #

def _reference(tgt, memory, params, nhead):
    L, N, E = tgt.shape
    Hd = E // nhead
    scale = 1.0 / math.sqrt(Hd)

    def mha(q_in, kv_in, p):
        w, b = p["in_proj_weight"], p["in_proj_bias"]
        q = q_in @ w[:E].T + b[:E]
        k = kv_in @ w[E:2 * E].T + b[E:2 * E]
        v = kv_in @ w[2 * E:].T + b[2 * E:]

        def split(x):                       # (T, N, E) -> (N, nhead, T, Hd)
            return x.reshape(x.shape[0], N, nhead, Hd).transpose(1, 2, 0, 3)

        qh, kh, vh = split(q) * scale, split(k), split(v)
        s = jnp.einsum("nhld,nhsd->nhls", qh, kh)
        a = jax.nn.softmax(s, axis=-1)
        o = jnp.einsum("nhls,nhsd->nhld", a, vh)
        o = o.transpose(2, 0, 1, 3).reshape(q_in.shape[0], N, E)
        return o @ p["out_proj_weight"].T + p["out_proj_bias"]

    x = tgt
    x = x + mha(x, x, params["self_attn"])
    x = x + mha(x, memory, params["multihead_attn"])
    h = x @ params["linear1_w"].T + params["linear1_b"]
    if LEAKY_SLOPE != 1.0:
        h = jnp.where(h >= 0, h, LEAKY_SLOPE * h)
    return x + h @ params["linear2_w"].T + params["linear2_b"]


# ---------------------------------- main ------------------------------------ #

if __name__ == "__main__":
    d_model, nhead, dim_feedforward = 32, 4, 16
    L, S, N = 8, 8, 2  # tgt seq len, memory seq len, batch

    root = jax.random.PRNGKey(0)
    k_tgt, k_mem, k_par = jax.random.split(root, 3)
    tgt = jax.random.normal(k_tgt, (L, N, d_model), jnp.float32)
    memory = jax.random.normal(k_mem, (S, N, d_model), jnp.float32)
    params = init_params(k_par, d_model, nhead, dim_feedforward)

    fwd = jax.jit(lambda t, m: transformer_decoder_layer(t, m, params, nhead))
    out = fwd(tgt, memory)
    jax.block_until_ready(out)
    assert out.shape == (L, N, d_model) and out.dtype == jnp.float32

    ref = _reference(tgt, memory, params, nhead)
    max_err = float(jnp.max(jnp.abs(out - ref)))
    assert max_err < 1e-3, f"kernel/reference mismatch: max abs err {max_err}"
    print("KERNEL_OK")
</pallas_src>

<mosaic_0001>
module attributes {stable_mosaic.version = 11 : i64} {
  func.func @_decoder_layer_kernel(%arg0: i32, %arg1: memref<1x8x32xf32, #tpu.memory_space<vmem>>, %arg2: memref<1x8x32xf32, #tpu.memory_space<vmem>>, %arg3: memref<32x32xf32, #tpu.memory_space<vmem>>, %arg4: memref<1x32xf32, #tpu.memory_space<vmem>>, %arg5: memref<32x32xf32, #tpu.memory_space<vmem>>, %arg6: memref<1x32xf32, #tpu.memory_space<vmem>>, %arg7: memref<32x32xf32, #tpu.memory_space<vmem>>, %arg8: memref<1x32xf32, #tpu.memory_space<vmem>>, %arg9: memref<32x32xf32, #tpu.memory_space<vmem>>, %arg10: memref<1x32xf32, #tpu.memory_space<vmem>>, %arg11: memref<32x32xf32, #tpu.memory_space<vmem>>, %arg12: memref<1x32xf32, #tpu.memory_space<vmem>>, %arg13: memref<32x32xf32, #tpu.memory_space<vmem>>, %arg14: memref<1x32xf32, #tpu.memory_space<vmem>>, %arg15: memref<32x32xf32, #tpu.memory_space<vmem>>, %arg16: memref<1x32xf32, #tpu.memory_space<vmem>>, %arg17: memref<32x32xf32, #tpu.memory_space<vmem>>, %arg18: memref<1x32xf32, #tpu.memory_space<vmem>>, %arg19: memref<32x16xf32, #tpu.memory_space<vmem>>, %arg20: memref<1x16xf32, #tpu.memory_space<vmem>>, %arg21: memref<16x32xf32, #tpu.memory_space<vmem>>, %arg22: memref<1x32xf32, #tpu.memory_space<vmem>>, %arg23: memref<1x8x32xf32, #tpu.memory_space<vmem>>, %arg24: memref<8x32xf32, #tpu.memory_space<vmem>>) attributes {dimension_semantics = [#tpu.dimension_semantics<parallel>], iteration_bounds = array<i64: 2>, scalar_prefetch = 0 : i64, scratch_operands = 1 : i64, tpu.core_type = #tpu.core_type<tc>, window_params = [{transform_indices = @transform_0, window_bounds = array<i64: 1, 8, 32>}, {transform_indices = @transform_1, window_bounds = array<i64: 1, 8, 32>}, {pipeline_mode = #tpu.pipeline_mode<synchronous>, transform_indices = @transform_2, window_bounds = array<i64: 32, 32>}, {pipeline_mode = #tpu.pipeline_mode<synchronous>, transform_indices = @transform_3, window_bounds = array<i64: 1, 32>}, {pipeline_mode = #tpu.pipeline_mode<synchronous>, transform_indices = @transform_4, window_bounds = array<i64: 32, 32>}, {pipeline_mode = #tpu.pipeline_mode<synchronous>, transform_indices = @transform_5, window_bounds = array<i64: 1, 32>}, {pipeline_mode = #tpu.pipeline_mode<synchronous>, transform_indices = @transform_6, window_bounds = array<i64: 32, 32>}, {pipeline_mode = #tpu.pipeline_mode<synchronous>, transform_indices = @transform_7, window_bounds = array<i64: 1, 32>}, {pipeline_mode = #tpu.pipeline_mode<synchronous>, transform_indices = @transform_8, window_bounds = array<i64: 32, 32>}, {pipeline_mode = #tpu.pipeline_mode<synchronous>, transform_indices = @transform_9, window_bounds = array<i64: 1, 32>}, {pipeline_mode = #tpu.pipeline_mode<synchronous>, transform_indices = @transform_10, window_bounds = array<i64: 32, 32>}, {pipeline_mode = #tpu.pipeline_mode<synchronous>, transform_indices = @transform_11, window_bounds = array<i64: 1, 32>}, {pipeline_mode = #tpu.pipeline_mode<synchronous>, transform_indices = @transform_12, window_bounds = array<i64: 32, 32>}, {pipeline_mode = #tpu.pipeline_mode<synchronous>, transform_indices = @transform_13, window_bounds = array<i64: 1, 32>}, {pipeline_mode = #tpu.pipeline_mode<synchronous>, transform_indices = @transform_14, window_bounds = array<i64: 32, 32>}, {pipeline_mode = #tpu.pipeline_mode<synchronous>, transform_indices = @transform_15, window_bounds = array<i64: 1, 32>}, {pipeline_mode = #tpu.pipeline_mode<synchronous>, transform_indices = @transform_16, window_bounds = array<i64: 32, 32>}, {pipeline_mode = #tpu.pipeline_mode<synchronous>, transform_indices = @transform_17, window_bounds = array<i64: 1, 32>}, {pipeline_mode = #tpu.pipeline_mode<synchronous>, transform_indices = @transform_18, window_bounds = array<i64: 32, 16>}, {pipeline_mode = #tpu.pipeline_mode<synchronous>, transform_indices = @transform_19, window_bounds = array<i64: 1, 16>}, {pipeline_mode = #tpu.pipeline_mode<synchronous>, transform_indices = @transform_20, window_bounds = array<i64: 16, 32>}, {pipeline_mode = #tpu.pipeline_mode<synchronous>, transform_indices = @transform_21, window_bounds = array<i64: 1, 32>}, {transform_indices = @transform_22, window_bounds = array<i64: 1, 8, 32>}]} {
    %c0 = arith.constant 0 : index
    %c0_0 = arith.constant 0 : index
    %c0_1 = arith.constant 0 : index
    %0 = vector.load %arg1[%c0, %c0_0, %c0_1] : memref<1x8x32xf32, #tpu.memory_space<vmem>>, vector<1x8x32xf32>
    %1 = vector.shape_cast %0 : vector<1x8x32xf32> to vector<8x32xf32>
    %c0_2 = arith.constant 0 : index
    %c0_3 = arith.constant 0 : index
    %c0_4 = arith.constant 0 : index
    %2 = vector.load %arg2[%c0_2, %c0_3, %c0_4] : memref<1x8x32xf32, #tpu.memory_space<vmem>>, vector<1x8x32xf32>
    %3 = vector.shape_cast %2 : vector<1x8x32xf32> to vector<8x32xf32>
    %c0_5 = arith.constant 0 : index
    %c0_6 = arith.constant 0 : index
    %4 = vector.load %arg3[%c0_5, %c0_6] : memref<32x32xf32, #tpu.memory_space<vmem>>, vector<32x32xf32>
    %cst = arith.constant dense<0.000000e+00> : vector<8x32xf32>
    %5 = tpu.matmul %1, %4, %cst {dimension_numbers = #tpu.dot_dimension_numbers<[1], [0], [0], [1], [0, 0, 1, 1], [], []>} : vector<8x32xf32>, vector<32x32xf32>, vector<8x32xf32> -> vector<8x32xf32>
    %c0_7 = arith.constant 0 : index
    %c0_8 = arith.constant 0 : index
    %6 = vector.load %arg4[%c0_7, %c0_8] : memref<1x32xf32, #tpu.memory_space<vmem>>, vector<1x32xf32>
    %7 = vector.broadcast %6 : vector<1x32xf32> to vector<8x32xf32>
    %8 = arith.addf %5, %7 : vector<8x32xf32>
    %c0_9 = arith.constant 0 : index
    %c0_10 = arith.constant 0 : index
    %9 = vector.load %arg5[%c0_9, %c0_10] : memref<32x32xf32, #tpu.memory_space<vmem>>, vector<32x32xf32>
    %cst_11 = arith.constant dense<0.000000e+00> : vector<8x32xf32>
    %10 = tpu.matmul %1, %9, %cst_11 {dimension_numbers = #tpu.dot_dimension_numbers<[1], [0], [0], [1], [0, 0, 1, 1], [], []>} : vector<8x32xf32>, vector<32x32xf32>, vector<8x32xf32> -> vector<8x32xf32>
    %c0_12 = arith.constant 0 : index
    %c0_13 = arith.constant 0 : index
    %11 = vector.load %arg6[%c0_12, %c0_13] : memref<1x32xf32, #tpu.memory_space<vmem>>, vector<1x32xf32>
    %12 = vector.broadcast %11 : vector<1x32xf32> to vector<8x32xf32>
    %13 = arith.addf %10, %12 : vector<8x32xf32>
    %c0_14 = arith.constant 0 : index
    %c0_15 = arith.constant 0 : index
    %14 = vector.load %arg7[%c0_14, %c0_15] : memref<32x32xf32, #tpu.memory_space<vmem>>, vector<32x32xf32>
    %cst_16 = arith.constant dense<0.000000e+00> : vector<8x32xf32>
    %15 = tpu.matmul %1, %14, %cst_16 {dimension_numbers = #tpu.dot_dimension_numbers<[1], [0], [0], [1], [0, 0, 1, 1], [], []>} : vector<8x32xf32>, vector<32x32xf32>, vector<8x32xf32> -> vector<8x32xf32>
    %c0_17 = arith.constant 0 : index
    %c0_18 = arith.constant 0 : index
    %16 = vector.load %arg8[%c0_17, %c0_18] : memref<1x32xf32, #tpu.memory_space<vmem>>, vector<1x32xf32>
    %17 = vector.broadcast %16 : vector<1x32xf32> to vector<8x32xf32>
    %18 = arith.addf %15, %17 : vector<8x32xf32>
    %cst_19 = arith.constant 0.353553385 : f32
    %19 = vector.broadcast %cst_19 : f32 to vector<8x32xf32>
    %20 = arith.mulf %8, %19 : vector<8x32xf32>
    %21 = tpu.transpose %13, [1, 0] : vector<8x32xf32> -> vector<32x8xf32>
    %22 = vector.extract_strided_slice %20 {offsets = [0, 0], sizes = [8, 8], strides = [1, 1]} : vector<8x32xf32> to vector<8x8xf32>
    %23 = vector.extract_strided_slice %21 {offsets = [0, 0], sizes = [8, 8], strides = [1, 1]} : vector<32x8xf32> to vector<8x8xf32>
    %cst_20 = arith.constant dense<0.000000e+00> : vector<8x8xf32>
    %24 = tpu.matmul %22, %23, %cst_20 {dimension_numbers = #tpu.dot_dimension_numbers<[1], [0], [0], [1], [0, 0, 1, 1], [], []>} : vector<8x8xf32>, vector<8x8xf32>, vector<8x8xf32> -> vector<8x8xf32>
    %cst_21 = arith.constant dense<0xFF800000> : vector<8xf32>
    %25 = vector.multi_reduction <maximumf>, %24, %cst_21 [1] : vector<8x8xf32> to vector<8xf32>
    %26 = vector.shape_cast %25 : vector<8xf32> to vector<8x1xf32>
    %27 = vector.broadcast %26 : vector<8x1xf32> to vector<8x8xf32>
    %28 = arith.subf %24, %27 : vector<8x8xf32>
    %29 = math.exp %28 : vector<8x8xf32>
    %cst_22 = arith.constant dense<0.000000e+00> : vector<8xf32>
    %30 = vector.multi_reduction <add>, %29, %cst_22 [1] : vector<8x8xf32> to vector<8xf32>
    %31 = vector.shape_cast %30 : vector<8xf32> to vector<8x1xf32>
    %32 = tpu.reciprocal %31 : vector<8x1xf32> -> vector<8x1xf32>
    %33 = vector.broadcast %32 : vector<8x1xf32> to vector<8x8xf32>
    %34 = arith.mulf %29, %33 : vector<8x8xf32>
    %35 = vector.extract_strided_slice %18 {offsets = [0, 0], sizes = [8, 8], strides = [1, 1]} : vector<8x32xf32> to vector<8x8xf32>
    %cst_23 = arith.constant dense<0.000000e+00> : vector<8x8xf32>
    %36 = tpu.matmul %34, %35, %cst_23 {dimension_numbers = #tpu.dot_dimension_numbers<[1], [0], [0], [1], [0, 0, 1, 1], [], []>} : vector<8x8xf32>, vector<8x8xf32>, vector<8x8xf32> -> vector<8x8xf32>
    %c0_24 = arith.constant 0 : index
    %c0_25 = arith.constant 0 : index
    %37 = vector.load %arg24[%c0_24, %c0_25] : memref<8x32xf32, #tpu.memory_space<vmem>>, vector<8x8xf32>
    tpu.vector_store %arg24[%c0_24, %c0_25], %36 {strides = array<i32>} : memref<8x32xf32, #tpu.memory_space<vmem>>, vector<8x8xf32>,
    %38 = vector.extract_strided_slice %20 {offsets = [0, 8], sizes = [8, 8], strides = [1, 1]} : vector<8x32xf32> to vector<8x8xf32>
    %39 = vector.extract_strided_slice %21 {offsets = [8, 0], sizes = [8, 8], strides = [1, 1]} : vector<32x8xf32> to vector<8x8xf32>
    %cst_26 = arith.constant dense<0.000000e+00> : vector<8x8xf32>
    %40 = tpu.matmul %38, %39, %cst_26 {dimension_numbers = #tpu.dot_dimension_numbers<[1], [0], [0], [1], [0, 0, 1, 1], [], []>} : vector<8x8xf32>, vector<8x8xf32>, vector<8x8xf32> -> vector<8x8xf32>
    %cst_27 = arith.constant dense<0xFF800000> : vector<8xf32>
    %41 = vector.multi_reduction <maximumf>, %40, %cst_27 [1] : vector<8x8xf32> to vector<8xf32>
    %42 = vector.shape_cast %41 : vector<8xf32> to vector<8x1xf32>
    %43 = vector.broadcast %42 : vector<8x1xf32> to vector<8x8xf32>
    %44 = arith.subf %40, %43 : vector<8x8xf32>
    %45 = math.exp %44 : vector<8x8xf32>
    %cst_28 = arith.constant dense<0.000000e+00> : vector<8xf32>
    %46 = vector.multi_reduction <add>, %45, %cst_28 [1] : vector<8x8xf32> to vector<8xf32>
    %47 = vector.shape_cast %46 : vector<8xf32> to vector<8x1xf32>
    %48 = tpu.reciprocal %47 : vector<8x1xf32> -> vector<8x1xf32>
    %49 = vector.broadcast %48 : vector<8x1xf32> to vector<8x8xf32>
    %50 = arith.mulf %45, %49 : vector<8x8xf32>
    %51 = vector.extract_strided_slice %18 {offsets = [0, 8], sizes = [8, 8], strides = [1, 1]} : vector<8x32xf32> to vector<8x8xf32>
    %cst_29 = arith.constant dense<0.000000e+00> : vector<8x8xf32>
    %52 = tpu.matmul %50, %51, %cst_29 {dimension_numbers = #tpu.dot_dimension_numbers<[1], [0], [0], [1], [0, 0, 1, 1], [], []>} : vector<8x8xf32>, vector<8x8xf32>, vector<8x8xf32> -> vector<8x8xf32>
    %c0_30 = arith.constant 0 : index
    %c8 = arith.constant 8 : index
    %53 = vector.load %arg24[%c0_30, %c8] : memref<8x32xf32, #tpu.memory_space<vmem>>, vector<8x8xf32>
    tpu.vector_store %arg24[%c0_30, %c8], %52 {strides = array<i32>} : memref<8x32xf32, #tpu.memory_space<vmem>>, vector<8x8xf32>,
    %54 = vector.extract_strided_slice %20 {offsets = [0, 16], sizes = [8, 8], strides = [1, 1]} : vector<8x32xf32> to vector<8x8xf32>
    %55 = vector.extract_strided_slice %21 {offsets = [16, 0], sizes = [8, 8], strides = [1, 1]} : vector<32x8xf32> to vector<8x8xf32>
    %cst_31 = arith.constant dense<0.000000e+00> : vector<8x8xf32>
    %56 = tpu.matmul %54, %55, %cst_31 {dimension_numbers = #tpu.dot_dimension_numbers<[1], [0], [0], [1], [0, 0, 1, 1], [], []>} : vector<8x8xf32>, vector<8x8xf32>, vector<8x8xf32> -> vector<8x8xf32>
    %cst_32 = arith.constant dense<0xFF800000> : vector<8xf32>
    %57 = vector.multi_reduction <maximumf>, %56, %cst_32 [1] : vector<8x8xf32> to vector<8xf32>
    %58 = vector.shape_cast %57 : vector<8xf32> to vector<8x1xf32>
    %59 = vector.broadcast %58 : vector<8x1xf32> to vector<8x8xf32>
    %60 = arith.subf %56, %59 : vector<8x8xf32>
    %61 = math.exp %60 : vector<8x8xf32>
    %cst_33 = arith.constant dense<0.000000e+00> : vector<8xf32>
    %62 = vector.multi_reduction <add>, %61, %cst_33 [1] : vector<8x8xf32> to vector<8xf32>
    %63 = vector.shape_cast %62 : vector<8xf32> to vector<8x1xf32>
    %64 = tpu.reciprocal %63 : vector<8x1xf32> -> vector<8x1xf32>
    %65 = vector.broadcast %64 : vector<8x1xf32> to vector<8x8xf32>
    %66 = arith.mulf %61, %65 : vector<8x8xf32>
    %67 = vector.extract_strided_slice %18 {offsets = [0, 16], sizes = [8, 8], strides = [1, 1]} : vector<8x32xf32> to vector<8x8xf32>
    %cst_34 = arith.constant dense<0.000000e+00> : vector<8x8xf32>
    %68 = tpu.matmul %66, %67, %cst_34 {dimension_numbers = #tpu.dot_dimension_numbers<[1], [0], [0], [1], [0, 0, 1, 1], [], []>} : vector<8x8xf32>, vector<8x8xf32>, vector<8x8xf32> -> vector<8x8xf32>
    %c0_35 = arith.constant 0 : index
    %c16 = arith.constant 16 : index
    %69 = vector.load %arg24[%c0_35, %c16] : memref<8x32xf32, #tpu.memory_space<vmem>>, vector<8x8xf32>
    tpu.vector_store %arg24[%c0_35, %c16], %68 {strides = array<i32>} : memref<8x32xf32, #tpu.memory_space<vmem>>, vector<8x8xf32>,
    %70 = vector.extract_strided_slice %20 {offsets = [0, 24], sizes = [8, 8], strides = [1, 1]} : vector<8x32xf32> to vector<8x8xf32>
    %71 = vector.extract_strided_slice %21 {offsets = [24, 0], sizes = [8, 8], strides = [1, 1]} : vector<32x8xf32> to vector<8x8xf32>
    %cst_36 = arith.constant dense<0.000000e+00> : vector<8x8xf32>
    %72 = tpu.matmul %70, %71, %cst_36 {dimension_numbers = #tpu.dot_dimension_numbers<[1], [0], [0], [1], [0, 0, 1, 1], [], []>} : vector<8x8xf32>, vector<8x8xf32>, vector<8x8xf32> -> vector<8x8xf32>
    %cst_37 = arith.constant dense<0xFF800000> : vector<8xf32>
    %73 = vector.multi_reduction <maximumf>, %72, %cst_37 [1] : vector<8x8xf32> to vector<8xf32>
    %74 = vector.shape_cast %73 : vector<8xf32> to vector<8x1xf32>
    %75 = vector.broadcast %74 : vector<8x1xf32> to vector<8x8xf32>
    %76 = arith.subf %72, %75 : vector<8x8xf32>
    %77 = math.exp %76 : vector<8x8xf32>
    %cst_38 = arith.constant dense<0.000000e+00> : vector<8xf32>
    %78 = vector.multi_reduction <add>, %77, %cst_38 [1] : vector<8x8xf32> to vector<8xf32>
    %79 = vector.shape_cast %78 : vector<8xf32> to vector<8x1xf32>
    %80 = tpu.reciprocal %79 : vector<8x1xf32> -> vector<8x1xf32>
    %81 = vector.broadcast %80 : vector<8x1xf32> to vector<8x8xf32>
    %82 = arith.mulf %77, %81 : vector<8x8xf32>
    %83 = vector.extract_strided_slice %18 {offsets = [0, 24], sizes = [8, 8], strides = [1, 1]} : vector<8x32xf32> to vector<8x8xf32>
    %cst_39 = arith.constant dense<0.000000e+00> : vector<8x8xf32>
    %84 = tpu.matmul %82, %83, %cst_39 {dimension_numbers = #tpu.dot_dimension_numbers<[1], [0], [0], [1], [0, 0, 1, 1], [], []>} : vector<8x8xf32>, vector<8x8xf32>, vector<8x8xf32> -> vector<8x8xf32>
    %c0_40 = arith.constant 0 : index
    %c24 = arith.constant 24 : index
    %85 = vector.load %arg24[%c0_40, %c24] : memref<8x32xf32, #tpu.memory_space<vmem>>, vector<8x8xf32>
    tpu.vector_store %arg24[%c0_40, %c24], %84 {strides = array<i32>} : memref<8x32xf32, #tpu.memory_space<vmem>>, vector<8x8xf32>,
    %c0_41 = arith.constant 0 : index
    %c0_42 = arith.constant 0 : index
    %86 = vector.load %arg24[%c0_41, %c0_42] : memref<8x32xf32, #tpu.memory_space<vmem>>, vector<8x32xf32>
    %c0_43 = arith.constant 0 : index
    %c0_44 = arith.constant 0 : index
    %87 = vector.load %arg9[%c0_43, %c0_44] : memref<32x32xf32, #tpu.memory_space<vmem>>, vector<32x32xf32>
    %cst_45 = arith.constant dense<0.000000e+00> : vector<8x32xf32>
    %88 = tpu.matmul %86, %87, %cst_45 {dimension_numbers = #tpu.dot_dimension_numbers<[1], [0], [0], [1], [0, 0, 1, 1], [], []>} : vector<8x32xf32>, vector<32x32xf32>, vector<8x32xf32> -> vector<8x32xf32>
    %c0_46 = arith.constant 0 : index
    %c0_47 = arith.constant 0 : index
    %89 = vector.load %arg10[%c0_46, %c0_47] : memref<1x32xf32, #tpu.memory_space<vmem>>, vector<1x32xf32>
    %90 = vector.broadcast %89 : vector<1x32xf32> to vector<8x32xf32>
    %91 = arith.addf %88, %90 : vector<8x32xf32>
    %92 = arith.addf %1, %91 : vector<8x32xf32>
    %c0_48 = arith.constant 0 : index
    %c0_49 = arith.constant 0 : index
    %93 = vector.load %arg11[%c0_48, %c0_49] : memref<32x32xf32, #tpu.memory_space<vmem>>, vector<32x32xf32>
    %cst_50 = arith.constant dense<0.000000e+00> : vector<8x32xf32>
    %94 = tpu.matmul %92, %93, %cst_50 {dimension_numbers = #tpu.dot_dimension_numbers<[1], [0], [0], [1], [0, 0, 1, 1], [], []>} : vector<8x32xf32>, vector<32x32xf32>, vector<8x32xf32> -> vector<8x32xf32>
    %c0_51 = arith.constant 0 : index
    %c0_52 = arith.constant 0 : index
    %95 = vector.load %arg12[%c0_51, %c0_52] : memref<1x32xf32, #tpu.memory_space<vmem>>, vector<1x32xf32>
    %96 = vector.broadcast %95 : vector<1x32xf32> to vector<8x32xf32>
    %97 = arith.addf %94, %96 : vector<8x32xf32>
    %c0_53 = arith.constant 0 : index
    %c0_54 = arith.constant 0 : index
    %98 = vector.load %arg13[%c0_53, %c0_54] : memref<32x32xf32, #tpu.memory_space<vmem>>, vector<32x32xf32>
    %cst_55 = arith.constant dense<0.000000e+00> : vector<8x32xf32>
    %99 = tpu.matmul %3, %98, %cst_55 {dimension_numbers = #tpu.dot_dimension_numbers<[1], [0], [0], [1], [0, 0, 1, 1], [], []>} : vector<8x32xf32>, vector<32x32xf32>, vector<8x32xf32> -> vector<8x32xf32>
    %c0_56 = arith.constant 0 : index
    %c0_57 = arith.constant 0 : index
    %100 = vector.load %arg14[%c0_56, %c0_57] : memref<1x32xf32, #tpu.memory_space<vmem>>, vector<1x32xf32>
    %101 = vector.broadcast %100 : vector<1x32xf32> to vector<8x32xf32>
    %102 = arith.addf %99, %101 : vector<8x32xf32>
    %c0_58 = arith.constant 0 : index
    %c0_59 = arith.constant 0 : index
    %103 = vector.load %arg15[%c0_58, %c0_59] : memref<32x32xf32, #tpu.memory_space<vmem>>, vector<32x32xf32>
    %cst_60 = arith.constant dense<0.000000e+00> : vector<8x32xf32>
    %104 = tpu.matmul %3, %103, %cst_60 {dimension_numbers = #tpu.dot_dimension_numbers<[1], [0], [0], [1], [0, 0, 1, 1], [], []>} : vector<8x32xf32>, vector<32x32xf32>, vector<8x32xf32> -> vector<8x32xf32>
    %c0_61 = arith.constant 0 : index
    %c0_62 = arith.constant 0 : index
    %105 = vector.load %arg16[%c0_61, %c0_62] : memref<1x32xf32, #tpu.memory_space<vmem>>, vector<1x32xf32>
    %106 = vector.broadcast %105 : vector<1x32xf32> to vector<8x32xf32>
    %107 = arith.addf %104, %106 : vector<8x32xf32>
    %cst_63 = arith.constant 0.353553385 : f32
    %108 = vector.broadcast %cst_63 : f32 to vector<8x32xf32>
    %109 = arith.mulf %97, %108 : vector<8x32xf32>
    %110 = tpu.transpose %102, [1, 0] : vector<8x32xf32> -> vector<32x8xf32>
    %111 = vector.extract_strided_slice %109 {offsets = [0, 0], sizes = [8, 8], strides = [1, 1]} : vector<8x32xf32> to vector<8x8xf32>
    %112 = vector.extract_strided_slice %110 {offsets = [0, 0], sizes = [8, 8], strides = [1, 1]} : vector<32x8xf32> to vector<8x8xf32>
    %cst_64 = arith.constant dense<0.000000e+00> : vector<8x8xf32>
    %113 = tpu.matmul %111, %112, %cst_64 {dimension_numbers = #tpu.dot_dimension_numbers<[1], [0], [0], [1], [0, 0, 1, 1], [], []>} : vector<8x8xf32>, vector<8x8xf32>, vector<8x8xf32> -> vector<8x8xf32>
    %cst_65 = arith.constant dense<0xFF800000> : vector<8xf32>
    %114 = vector.multi_reduction <maximumf>, %113, %cst_65 [1] : vector<8x8xf32> to vector<8xf32>
    %115 = vector.shape_cast %114 : vector<8xf32> to vector<8x1xf32>
    %116 = vector.broadcast %115 : vector<8x1xf32> to vector<8x8xf32>
    %117 = arith.subf %113, %116 : vector<8x8xf32>
    %118 = math.exp %117 : vector<8x8xf32>
    %cst_66 = arith.constant dense<0.000000e+00> : vector<8xf32>
    %119 = vector.multi_reduction <add>, %118, %cst_66 [1] : vector<8x8xf32> to vector<8xf32>
    %120 = vector.shape_cast %119 : vector<8xf32> to vector<8x1xf32>
    %121 = tpu.reciprocal %120 : vector<8x1xf32> -> vector<8x1xf32>
    %122 = vector.broadcast %121 : vector<8x1xf32> to vector<8x8xf32>
    %123 = arith.mulf %118, %122 : vector<8x8xf32>
    %124 = vector.extract_strided_slice %107 {offsets = [0, 0], sizes = [8, 8], strides = [1, 1]} : vector<8x32xf32> to vector<8x8xf32>
    %cst_67 = arith.constant dense<0.000000e+00> : vector<8x8xf32>
    %125 = tpu.matmul %123, %124, %cst_67 {dimension_numbers = #tpu.dot_dimension_numbers<[1], [0], [0], [1], [0, 0, 1, 1], [], []>} : vector<8x8xf32>, vector<8x8xf32>, vector<8x8xf32> -> vector<8x8xf32>
    %c0_68 = arith.constant 0 : index
    %c0_69 = arith.constant 0 : index
    %126 = vector.load %arg24[%c0_68, %c0_69] : memref<8x32xf32, #tpu.memory_space<vmem>>, vector<8x8xf32>
    tpu.vector_store %arg24[%c0_68, %c0_69], %125 {strides = array<i32>} : memref<8x32xf32, #tpu.memory_space<vmem>>, vector<8x8xf32>,
    %127 = vector.extract_strided_slice %109 {offsets = [0, 8], sizes = [8, 8], strides = [1, 1]} : vector<8x32xf32> to vector<8x8xf32>
    %128 = vector.extract_strided_slice %110 {offsets = [8, 0], sizes = [8, 8], strides = [1, 1]} : vector<32x8xf32> to vector<8x8xf32>
    %cst_70 = arith.constant dense<0.000000e+00> : vector<8x8xf32>
    %129 = tpu.matmul %127, %128, %cst_70 {dimension_numbers = #tpu.dot_dimension_numbers<[1], [0], [0], [1], [0, 0, 1, 1], [], []>} : vector<8x8xf32>, vector<8x8xf32>, vector<8x8xf32> -> vector<8x8xf32>
    %cst_71 = arith.constant dense<0xFF800000> : vector<8xf32>
    %130 = vector.multi_reduction <maximumf>, %129, %cst_71 [1] : vector<8x8xf32> to vector<8xf32>
    %131 = vector.shape_cast %130 : vector<8xf32> to vector<8x1xf32>
    %132 = vector.broadcast %131 : vector<8x1xf32> to vector<8x8xf32>
    %133 = arith.subf %129, %132 : vector<8x8xf32>
    %134 = math.exp %133 : vector<8x8xf32>
    %cst_72 = arith.constant dense<0.000000e+00> : vector<8xf32>
    %135 = vector.multi_reduction <add>, %134, %cst_72 [1] : vector<8x8xf32> to vector<8xf32>
    %136 = vector.shape_cast %135 : vector<8xf32> to vector<8x1xf32>
    %137 = tpu.reciprocal %136 : vector<8x1xf32> -> vector<8x1xf32>
    %138 = vector.broadcast %137 : vector<8x1xf32> to vector<8x8xf32>
    %139 = arith.mulf %134, %138 : vector<8x8xf32>
    %140 = vector.extract_strided_slice %107 {offsets = [0, 8], sizes = [8, 8], strides = [1, 1]} : vector<8x32xf32> to vector<8x8xf32>
    %cst_73 = arith.constant dense<0.000000e+00> : vector<8x8xf32>
    %141 = tpu.matmul %139, %140, %cst_73 {dimension_numbers = #tpu.dot_dimension_numbers<[1], [0], [0], [1], [0, 0, 1, 1], [], []>} : vector<8x8xf32>, vector<8x8xf32>, vector<8x8xf32> -> vector<8x8xf32>
    %c0_74 = arith.constant 0 : index
    %c8_75 = arith.constant 8 : index
    %142 = vector.load %arg24[%c0_74, %c8_75] : memref<8x32xf32, #tpu.memory_space<vmem>>, vector<8x8xf32>
    tpu.vector_store %arg24[%c0_74, %c8_75], %141 {strides = array<i32>} : memref<8x32xf32, #tpu.memory_space<vmem>>, vector<8x8xf32>,
    %143 = vector.extract_strided_slice %109 {offsets = [0, 16], sizes = [8, 8], strides = [1, 1]} : vector<8x32xf32> to vector<8x8xf32>
    %144 = vector.extract_strided_slice %110 {offsets = [16, 0], sizes = [8, 8], strides = [1, 1]} : vector<32x8xf32> to vector<8x8xf32>
    %cst_76 = arith.constant dense<0.000000e+00> : vector<8x8xf32>
    %145 = tpu.matmul %143, %144, %cst_76 {dimension_numbers = #tpu.dot_dimension_numbers<[1], [0], [0], [1], [0, 0, 1, 1], [], []>} : vector<8x8xf32>, vector<8x8xf32>, vector<8x8xf32> -> vector<8x8xf32>
    %cst_77 = arith.constant dense<0xFF800000> : vector<8xf32>
    %146 = vector.multi_reduction <maximumf>, %145, %cst_77 [1] : vector<8x8xf32> to vector<8xf32>
    %147 = vector.shape_cast %146 : vector<8xf32> to vector<8x1xf32>
    %148 = vector.broadcast %147 : vector<8x1xf32> to vector<8x8xf32>
    %149 = arith.subf %145, %148 : vector<8x8xf32>
    %150 = math.exp %149 : vector<8x8xf32>
    %cst_78 = arith.constant dense<0.000000e+00> : vector<8xf32>
    %151 = vector.multi_reduction <add>, %150, %cst_78 [1] : vector<8x8xf32> to vector<8xf32>
    %152 = vector.shape_cast %151 : vector<8xf32> to vector<8x1xf32>
    %153 = tpu.reciprocal %152 : vector<8x1xf32> -> vector<8x1xf32>
    %154 = vector.broadcast %153 : vector<8x1xf32> to vector<8x8xf32>
    %155 = arith.mulf %150, %154 : vector<8x8xf32>
    %156 = vector.extract_strided_slice %107 {offsets = [0, 16], sizes = [8, 8], strides = [1, 1]} : vector<8x32xf32> to vector<8x8xf32>
    %cst_79 = arith.constant dense<0.000000e+00> : vector<8x8xf32>
    %157 = tpu.matmul %155, %156, %cst_79 {dimension_numbers = #tpu.dot_dimension_numbers<[1], [0], [0], [1], [0, 0, 1, 1], [], []>} : vector<8x8xf32>, vector<8x8xf32>, vector<8x8xf32> -> vector<8x8xf32>
    %c0_80 = arith.constant 0 : index
    %c16_81 = arith.constant 16 : index
    %158 = vector.load %arg24[%c0_80, %c16_81] : memref<8x32xf32, #tpu.memory_space<vmem>>, vector<8x8xf32>
    tpu.vector_store %arg24[%c0_80, %c16_81], %157 {strides = array<i32>} : memref<8x32xf32, #tpu.memory_space<vmem>>, vector<8x8xf32>,
    %159 = vector.extract_strided_slice %109 {offsets = [0, 24], sizes = [8, 8], strides = [1, 1]} : vector<8x32xf32> to vector<8x8xf32>
    %160 = vector.extract_strided_slice %110 {offsets = [24, 0], sizes = [8, 8], strides = [1, 1]} : vector<32x8xf32> to vector<8x8xf32>
    %cst_82 = arith.constant dense<0.000000e+00> : vector<8x8xf32>
    %161 = tpu.matmul %159, %160, %cst_82 {dimension_numbers = #tpu.dot_dimension_numbers<[1], [0], [0], [1], [0, 0, 1, 1], [], []>} : vector<8x8xf32>, vector<8x8xf32>, vector<8x8xf32> -> vector<8x8xf32>
    %cst_83 = arith.constant dense<0xFF800000> : vector<8xf32>
    %162 = vector.multi_reduction <maximumf>, %161, %cst_83 [1] : vector<8x8xf32> to vector<8xf32>
    %163 = vector.shape_cast %162 : vector<8xf32> to vector<8x1xf32>
    %164 = vector.broadcast %163 : vector<8x1xf32> to vector<8x8xf32>
    %165 = arith.subf %161, %164 : vector<8x8xf32>
    %166 = math.exp %165 : vector<8x8xf32>
    %cst_84 = arith.constant dense<0.000000e+00> : vector<8xf32>
    %167 = vector.multi_reduction <add>, %166, %cst_84 [1] : vector<8x8xf32> to vector<8xf32>
    %168 = vector.shape_cast %167 : vector<8xf32> to vector<8x1xf32>
    %169 = tpu.reciprocal %168 : vector<8x1xf32> -> vector<8x1xf32>
    %170 = vector.broadcast %169 : vector<8x1xf32> to vector<8x8xf32>
    %171 = arith.mulf %166, %170 : vector<8x8xf32>
    %172 = vector.extract_strided_slice %107 {offsets = [0, 24], sizes = [8, 8], strides = [1, 1]} : vector<8x32xf32> to vector<8x8xf32>
    %cst_85 = arith.constant dense<0.000000e+00> : vector<8x8xf32>
    %173 = tpu.matmul %171, %172, %cst_85 {dimension_numbers = #tpu.dot_dimension_numbers<[1], [0], [0], [1], [0, 0, 1, 1], [], []>} : vector<8x8xf32>, vector<8x8xf32>, vector<8x8xf32> -> vector<8x8xf32>
    %c0_86 = arith.constant 0 : index
    %c24_87 = arith.constant 24 : index
    %174 = vector.load %arg24[%c0_86, %c24_87] : memref<8x32xf32, #tpu.memory_space<vmem>>, vector<8x8xf32>
    tpu.vector_store %arg24[%c0_86, %c24_87], %173 {strides = array<i32>} : memref<8x32xf32, #tpu.memory_space<vmem>>, vector<8x8xf32>,
    %c0_88 = arith.constant 0 : index
    %c0_89 = arith.constant 0 : index
    %175 = vector.load %arg24[%c0_88, %c0_89] : memref<8x32xf32, #tpu.memory_space<vmem>>, vector<8x32xf32>
    %c0_90 = arith.constant 0 : index
    %c0_91 = arith.constant 0 : index
    %176 = vector.load %arg17[%c0_90, %c0_91] : memref<32x32xf32, #tpu.memory_space<vmem>>, vector<32x32xf32>
    %cst_92 = arith.constant dense<0.000000e+00> : vector<8x32xf32>
    %177 = tpu.matmul %175, %176, %cst_92 {dimension_numbers = #tpu.dot_dimension_numbers<[1], [0], [0], [1], [0, 0, 1, 1], [], []>} : vector<8x32xf32>, vector<32x32xf32>, vector<8x32xf32> -> vector<8x32xf32>
    %c0_93 = arith.constant 0 : index
    %c0_94 = arith.constant 0 : index
    %178 = vector.load %arg18[%c0_93, %c0_94] : memref<1x32xf32, #tpu.memory_space<vmem>>, vector<1x32xf32>
    %179 = vector.broadcast %178 : vector<1x32xf32> to vector<8x32xf32>
    %180 = arith.addf %177, %179 : vector<8x32xf32>
    %181 = arith.addf %92, %180 : vector<8x32xf32>
    %c0_95 = arith.constant 0 : index
    %c0_96 = arith.constant 0 : index
    %182 = vector.load %arg19[%c0_95, %c0_96] : memref<32x16xf32, #tpu.memory_space<vmem>>, vector<32x16xf32>
    %cst_97 = arith.constant dense<0.000000e+00> : vector<8x16xf32>
    %183 = tpu.matmul %181, %182, %cst_97 {dimension_numbers = #tpu.dot_dimension_numbers<[1], [0], [0], [1], [0, 0, 1, 1], [], []>} : vector<8x32xf32>, vector<32x16xf32>, vector<8x16xf32> -> vector<8x16xf32>
    %c0_98 = arith.constant 0 : index
    %c0_99 = arith.constant 0 : index
    %184 = vector.load %arg20[%c0_98, %c0_99] : memref<1x16xf32, #tpu.memory_space<vmem>>, vector<1x16xf32>
    %185 = vector.broadcast %184 : vector<1x16xf32> to vector<8x16xf32>
    %186 = arith.addf %183, %185 : vector<8x16xf32>
    %c0_100 = arith.constant 0 : index
    %c0_101 = arith.constant 0 : index
    %187 = vector.load %arg21[%c0_100, %c0_101] : memref<16x32xf32, #tpu.memory_space<vmem>>, vector<16x32xf32>
    %cst_102 = arith.constant dense<0.000000e+00> : vector<8x32xf32>
    %188 = tpu.matmul %186, %187, %cst_102 {dimension_numbers = #tpu.dot_dimension_numbers<[1], [0], [0], [1], [0, 0, 1, 1], [], []>} : vector<8x16xf32>, vector<16x32xf32>, vector<8x32xf32> -> vector<8x32xf32>
    %189 = arith.addf %181, %188 : vector<8x32xf32>
    %c0_103 = arith.constant 0 : index
    %c0_104 = arith.constant 0 : index
    %190 = vector.load %arg22[%c0_103, %c0_104] : memref<1x32xf32, #tpu.memory_space<vmem>>, vector<1x32xf32>
    %191 = vector.broadcast %190 : vector<1x32xf32> to vector<8x32xf32>
    %192 = arith.addf %189, %191 : vector<8x32xf32>
    %193 = vector.shape_cast %192 : vector<8x32xf32> to vector<1x8x32xf32>
    %c0_105 = arith.constant 0 : index
    %c0_106 = arith.constant 0 : index
    %c0_107 = arith.constant 0 : index
    %194 = vector.load %arg23[%c0_105, %c0_106, %c0_107] : memref<1x8x32xf32, #tpu.memory_space<vmem>>, vector<1x8x32xf32>
    tpu.vector_store %arg23[%c0_105, %c0_106, %c0_107], %193 {strides = array<i32>} : memref<1x8x32xf32, #tpu.memory_space<vmem>>, vector<1x8x32xf32>,
    return
  }
  func.func @transform_0(%arg0: i32) -> (i32, i32, i32) {
    %c0_i32 = arith.constant 0 : i32
    %c0_i32_0 = arith.constant 0 : i32
    %c0_i32_1 = arith.constant 0 : i32
    return %arg0, %c0_i32, %c0_i32_0 : i32, i32, i32
  }
  func.func @transform_1(%arg0: i32) -> (i32, i32, i32) {
    %c0_i32 = arith.constant 0 : i32
    %c0_i32_0 = arith.constant 0 : i32
    %c0_i32_1 = arith.constant 0 : i32
    return %arg0, %c0_i32, %c0_i32_0 : i32, i32, i32
  }
  func.func @transform_2(%arg0: i32) -> (i32, i32) {
    %c0_i32 = arith.constant 0 : i32
    %c0_i32_0 = arith.constant 0 : i32
    %c0_i32_1 = arith.constant 0 : i32
    return %c0_i32, %c0_i32_0 : i32, i32
  }
  func.func @transform_3(%arg0: i32) -> (i32, i32) {
    %c0_i32 = arith.constant 0 : i32
    %c0_i32_0 = arith.constant 0 : i32
    %c0_i32_1 = arith.constant 0 : i32
    return %c0_i32, %c0_i32_0 : i32, i32
  }
  func.func @transform_4(%arg0: i32) -> (i32, i32) {
    %c0_i32 = arith.constant 0 : i32
    %c0_i32_0 = arith.constant 0 : i32
    %c0_i32_1 = arith.constant 0 : i32
    return %c0_i32, %c0_i32_0 : i32, i32
  }
  func.func @transform_5(%arg0: i32) -> (i32, i32) {
    %c0_i32 = arith.constant 0 : i32
    %c0_i32_0 = arith.constant 0 : i32
    %c0_i32_1 = arith.constant 0 : i32
    return %c0_i32, %c0_i32_0 : i32, i32
  }
  func.func @transform_6(%arg0: i32) -> (i32, i32) {
    %c0_i32 = arith.constant 0 : i32
    %c0_i32_0 = arith.constant 0 : i32
    %c0_i32_1 = arith.constant 0 : i32
    return %c0_i32, %c0_i32_0 : i32, i32
  }
  func.func @transform_7(%arg0: i32) -> (i32, i32) {
    %c0_i32 = arith.constant 0 : i32
    %c0_i32_0 = arith.constant 0 : i32
    %c0_i32_1 = arith.constant 0 : i32
    return %c0_i32, %c0_i32_0 : i32, i32
  }
  func.func @transform_8(%arg0: i32) -> (i32, i32) {
    %c0_i32 = arith.constant 0 : i32
    %c0_i32_0 = arith.constant 0 : i32
    %c0_i32_1 = arith.constant 0 : i32
    return %c0_i32, %c0_i32_0 : i32, i32
  }
  func.func @transform_9(%arg0: i32) -> (i32, i32) {
    %c0_i32 = arith.constant 0 : i32
    %c0_i32_0 = arith.constant 0 : i32
    %c0_i32_1 = arith.constant 0 : i32
    return %c0_i32, %c0_i32_0 : i32, i32
  }
  func.func @transform_10(%arg0: i32) -> (i32, i32) {
    %c0_i32 = arith.constant 0 : i32
    %c0_i32_0 = arith.constant 0 : i32
    %c0_i32_1 = arith.constant 0 : i32
    return %c0_i32, %c0_i32_0 : i32, i32
  }
  func.func @transform_11(%arg0: i32) -> (i32, i32) {
    %c0_i32 = arith.constant 0 : i32
    %c0_i32_0 = arith.constant 0 : i32
    %c0_i32_1 = arith.constant 0 : i32
    return %c0_i32, %c0_i32_0 : i32, i32
  }
  func.func @transform_12(%arg0: i32) -> (i32, i32) {
    %c0_i32 = arith.constant 0 : i32
    %c0_i32_0 = arith.constant 0 : i32
    %c0_i32_1 = arith.constant 0 : i32
    return %c0_i32, %c0_i32_0 : i32, i32
  }
  func.func @transform_13(%arg0: i32) -> (i32, i32) {
    %c0_i32 = arith.constant 0 : i32
    %c0_i32_0 = arith.constant 0 : i32
    %c0_i32_1 = arith.constant 0 : i32
    return %c0_i32, %c0_i32_0 : i32, i32
  }
  func.func @transform_14(%arg0: i32) -> (i32, i32) {
    %c0_i32 = arith.constant 0 : i32
    %c0_i32_0 = arith.constant 0 : i32
    %c0_i32_1 = arith.constant 0 : i32
    return %c0_i32, %c0_i32_0 : i32, i32
  }
  func.func @transform_15(%arg0: i32) -> (i32, i32) {
    %c0_i32 = arith.constant 0 : i32
    %c0_i32_0 = arith.constant 0 : i32
    %c0_i32_1 = arith.constant 0 : i32
    return %c0_i32, %c0_i32_0 : i32, i32
  }
  func.func @transform_16(%arg0: i32) -> (i32, i32) {
    %c0_i32 = arith.constant 0 : i32
    %c0_i32_0 = arith.constant 0 : i32
    %c0_i32_1 = arith.constant 0 : i32
    return %c0_i32, %c0_i32_0 : i32, i32
  }
  func.func @transform_17(%arg0: i32) -> (i32, i32) {
    %c0_i32 = arith.constant 0 : i32
    %c0_i32_0 = arith.constant 0 : i32
    %c0_i32_1 = arith.constant 0 : i32
    return %c0_i32, %c0_i32_0 : i32, i32
  }
  func.func @transform_18(%arg0: i32) -> (i32, i32) {
    %c0_i32 = arith.constant 0 : i32
    %c0_i32_0 = arith.constant 0 : i32
    %c0_i32_1 = arith.constant 0 : i32
    return %c0_i32, %c0_i32_0 : i32, i32
  }
  func.func @transform_19(%arg0: i32) -> (i32, i32) {
    %c0_i32 = arith.constant 0 : i32
    %c0_i32_0 = arith.constant 0 : i32
    %c0_i32_1 = arith.constant 0 : i32
    return %c0_i32, %c0_i32_0 : i32, i32
  }
  func.func @transform_20(%arg0: i32) -> (i32, i32) {
    %c0_i32 = arith.constant 0 : i32
    %c0_i32_0 = arith.constant 0 : i32
    %c0_i32_1 = arith.constant 0 : i32
    return %c0_i32, %c0_i32_0 : i32, i32
  }
  func.func @transform_21(%arg0: i32) -> (i32, i32) {
    %c0_i32 = arith.constant 0 : i32
    %c0_i32_0 = arith.constant 0 : i32
    %c0_i32_1 = arith.constant 0 : i32
    return %c0_i32, %c0_i32_0 : i32, i32
  }
  func.func @transform_22(%arg0: i32) -> (i32, i32, i32) {
    %c0_i32 = arith.constant 0 : i32
    %c0_i32_0 = arith.constant 0 : i32
    %c0_i32_1 = arith.constant 0 : i32
    return %arg0, %c0_i32, %c0_i32_0 : i32, i32, i32
  }
}

</mosaic_0001>

<bundles_post_ra>
// kernel: _lambda_.1
= control target key start
LH: loop header
LB: loop body
LE: loop exit
PB: predicated region body
PF: predicated region fallthrough
CT: control target
= control target key end

     0   :  { %s3037_s0 = inlined_call_operand.vmem [shape: f32[2,8,32], index: 0, kind: input, shape index: {}]   ;;  %s3038_s1 = inlined_call_operand.vmem [shape: f32[2,8,32], index: 1, kind: input, shape index: {}]   ;;  %s3039_s2 = inlined_call_operand.hbm [shape: f32[32,32], index: 2, kind: input, shape index: {}]   ;;  %s3040_s3 = inlined_call_operand.hbm [shape: f32[1,32], index: 3, kind: input, shape index: {}]   ;;  %s3041_s4 = inlined_call_operand.hbm [shape: f32[32,32], index: 4, kind: input, shape index: {}]   ;;  %s3042_s5 = inlined_call_operand.hbm [shape: f32[1,32], index: 5, kind: input, shape index: {}]   ;;  %s3043_s6 = inlined_call_operand.hbm [shape: f32[32,32], index: 6, kind: input, shape index: {}]   ;;  %s3044_s7 = inlined_call_operand.hbm [shape: f32[1,32], index: 7, kind: input, shape index: {}]   ;;  %s3045_s8 = inlined_call_operand.hbm [shape: f32[32,32], index: 8, kind: input, shape index: {}]   ;;  %s3046_s9 = inlined_call_operand.vmem [shape: f32[1,32], index: 9, kind: input, shape index: {}]   ;;  %s3047_s10 = inlined_call_operand.hbm [shape: f32[32,32], index: 10, kind: input, shape index: {}]   ;;  %s3048_s11 = inlined_call_operand.vmem [shape: f32[1,32], index: 11, kind: input, shape index: {}]   ;;  %s3049_s12 = inlined_call_operand.hbm [shape: f32[32,32], index: 12, kind: input, shape index: {}]   ;;  %s3050_s13 = inlined_call_operand.vmem [shape: f32[1,32], index: 13, kind: input, shape index: {}]   ;;  %s3051_s14 = inlined_call_operand.hbm [shape: f32[32,32], index: 14, kind: input, shape index: {}]   ;;  %s3052_s15 = inlined_call_operand.vmem [shape: f32[1,32], index: 15, kind: input, shape index: {}]   ;;  %s3053_s16 = inlined_call_operand.hbm [shape: f32[32,32], index: 16, kind: input, shape index: {}]   ;;  %s3054_s17 = inlined_call_operand.vmem [shape: f32[1,32], index: 17, kind: input, shape index: {}]   ;;  %s3055_s18 = inlined_call_operand.vmem [shape: f32[32,16], index: 18, kind: input, shape index: {}]   ;;  %s3056_s19 = inlined_call_operand.vmem [shape: f32[1,16], index: 19, kind: input, shape index: {}]   ;;  %s3057_s20 = inlined_call_operand.vmem [shape: f32[16,32], index: 20, kind: input, shape index: {}]   ;;  %s3058_s21 = inlined_call_operand.vmem [shape: f32[1,32], index: 21, kind: input, shape index: {}]   ;;  %s3059_s22 = inlined_call_operand.vmem [shape: f32[2,8,32], index: 22, kind: output, shape index: {}]  }
   0x1   :  { %3061 = sst [smem:[#allocation27_spill]] %s3037_s0 }
   0x2   :  { %3062 = sst [smem:[#allocation28_spill]] %s3038_s1 }
   0x3   :  { %3063 = sst [smem:[#allocation29_spill]] %s3039_s2 }
   0x4   :  { %3064 = sst [smem:[#allocation30_spill]] %s3040_s3 }
   0x5   :  { %3065 = sst [smem:[#allocation31_spill]] %s3041_s4 }
   0x6   :  { %3066 = sst [smem:[#allocation32_spill]] %s3042_s5 }
   0x7   :  { %3067 = sst [smem:[#allocation33_spill]] %s3043_s6 }
   0x8   :  { %3068 = sst [smem:[#allocation34_spill]] %s3044_s7 }
   0x9   :  { %3069 = sst [smem:[#allocation35_spill]] %s3047_s10 }
   0xa   :  { %3070 = sst [smem:[#allocation36_spill]] %s3051_s14 }
   0xb   :  { %3071 = sst [smem:[#allocation37_spill]] %s3059_s22 }
   0xc   :  { %27 = vsyncpa [#allocation4], 0 }
   0xd   :  { %28 = vsyncpa [#allocation6], 0 }
   0xe   :  { %29 = vsyncpa [#allocation9], 0 }
   0xf   :  { %30 = vsyncpa [#allocation12], 0 }
  0x10   :  { %31 = vsyncpa [#allocation15], 0 }
  0x11   :  { %32 = vsyncpa [#allocation18], 0  ;;  %s2739_s3 = smov 0  }
  0x12 LB: > { %3072 = sst [smem:[#allocation26_spill]] %s2603_s3  ;;  %s2748_s0 = sadd.s32 4294967295, %s2603_s3   ;;  %s2603_s3 = sphi %s2739_s3, %s38_s3  }
  0x13   : > { %s3073_s30 = sld [smem:[#allocation30_spill]]  ;;  %p2010_p0 = scmp.ge.s32.totalorder %s2603_s3, 1 }
  0x14   : > { %p541_p1 = scmp.lt.s32.totalorder %s2603_s3, 3  ;;  %p2152_p2 = scmp.eq.s32.totalorder %s2748_s0, 0 }
  0x15   : > { %s2605_s1 = smov [#allocation5]   ;;  %s3075_s25 = sld [smem:[#allocation32_spill]] }
  0x16   : > { %p2753_p3 = pnand %p2010_p0, %p541_p1  ;;  %s569_s5 = sshll.u32 %s2605_s1, 4  ;;  %s570_s5 = int_to_ptr.vmem [resolvable:$true] %s569_s5 }
  0x17   : > { %s3076_s7 = sld [smem:[#allocation34_spill]]  ;;  %s2607_s24 = smov [#allocation11]  }
  0x18   : > { %p2118_p4 = pneg %p2753_p3  ;;  %s621_s6 = sshll.u32 %s2607_s24, 4  ;;  %s622_s6 = int_to_ptr.vmem [resolvable:$true] %s621_s6 }
  0x19   : > { %s567_s4 = sshll.u32 %s3073_s30, 4  ;;  %s2606_s30 = smov [#allocation8]   ;;  %s568_s4 = int_to_ptr.hbm [resolvable:$true] %s567_s4 }
  0x1a   : > { %p2767_p5 = pnand %p2152_p2, %p2118_p4  ;;  %s595_s1 = sshll.u32 %s2606_s30, 4  ;;  %s596_s1 = int_to_ptr.vmem [resolvable:$true] %s595_s1 }
  0x1b   : > { %s593_s26 = sshll.u32 %s3075_s25, 4  ;;  %s3078_s10 = sld [smem:[#allocation35_spill]]  ;;  %s594_s26 = int_to_ptr.hbm [resolvable:$true] %s593_s26 }
  0x1c   : > { %2124 = dma.hbm_to_vmem [thread:$0]  (!%p2767_p5), %s568_s4, 16, %s570_s5, [#allocation6]  }
  0x1d   : > { %s619_s28 = sshll.u32 %s3076_s7, 4  ;;  %s2608_s7 = smov [#allocation14]   ;;  %s620_s28 = int_to_ptr.hbm [resolvable:$true] %s619_s28 }
  0x1e   : > { %2130 = dma.hbm_to_vmem [thread:$0]  (!%p2767_p5), %s594_s26, 16, %s596_s1, [#allocation9]  }
  0x1f   : > { %2136 = dma.hbm_to_vmem [thread:$0]  (!%p2767_p5), %s620_s28, 16, %s622_s6, [#allocation12]  }
  0x20   : > { %s649_s30 = sshll.u32 %s2608_s7, 4  ;;  %s3079_s14 = sld [smem:[#allocation36_spill]]  ;;  %s650_s30 = int_to_ptr.vmem [resolvable:$true] %s649_s30 }
  0x21   : > { %s647_s27 = sshll.u32 %s3078_s10, 4  ;;  %s2609_s5 = smov 128   ;;  %s648_s27 = int_to_ptr.hbm [resolvable:$true] %s647_s27 }
  0x22   : > { %s2610_s26 = smov 8   ;;  %s2611_s28 = smov [#allocation17]  }
  0x23   : > { %2142 = dma.hbm_to_vmem [thread:$0]  (!%p2767_p5), %s648_s27, 512, %s650_s30, [#allocation15], %s2609_s5, %s2609_s5, %s2610_s26  }
  0x24   : > { %s683_s1 = sshll.u32 %s2611_s28, 4  ;;  %s3080_s25 = sld [smem:[#allocation29_spill]]  ;;  %s684_s1 = int_to_ptr.vmem [resolvable:$true] %s683_s1 }
  0x25   : > { %s3081_s2 = sld [smem:[#allocation31_spill]]  ;;  %s2612_s27 = smov [#allocation3]  }
  0x26   : > { %s681_s4 = sshll.u32 %s3079_s14, 4  ;;  %s554_s30 = sshll.u32 %s2612_s27, 4  ;;  %s682_s4 = int_to_ptr.hbm [resolvable:$true] %s681_s4  ;;  %s555_s30 = int_to_ptr.vmem [resolvable:$true] %s554_s30 }
  0x27   : > { %2148 = dma.hbm_to_vmem [thread:$0]  (!%p2767_p5), %s682_s4, 512, %s684_s1, [#allocation18], %s2609_s5, %s2609_s5, %s2610_s26  }
  0x28   : > { %s2613_s28 = smov [#allocation7]   ;;  %s3082_s14 = sld [smem:[#allocation33_spill]] }
  0x29   : > { %s580_s24 = sshll.u32 %s2613_s28, 4  ;;  %s630_s3 = sshll.u32 %s3045_s8, 4  ;;  %s581_s24 = int_to_ptr.vmem [resolvable:$true] %s580_s24  ;;  %s631_s3 = int_to_ptr.hbm [resolvable:$true] %s630_s3 }
  0x2a   : > { %s552_s7 = sshll.u32 %s3080_s25, 4  ;;  %s698_s25 = sshll.u32 %s3053_s16, 4  ;;  %s553_s7 = int_to_ptr.hbm [resolvable:$true] %s552_s7  ;;  %s699_s25 = int_to_ptr.hbm [resolvable:$true] %s698_s25 }
  0x2b   : > { %s578_s10 = sshll.u32 %s3081_s2, 4  ;;  %s2614_s2 = smov [#allocation10]   ;;  %s579_s10 = int_to_ptr.hbm [resolvable:$true] %s578_s10 }
  0x2c   : > { %2121 = dma.hbm_to_vmem [thread:$0]  (!%p2767_p5), %s553_s7, 512, %s555_s30, [#allocation4], %s2609_s5, %s2609_s5, %s2610_s26  }
  0x2d   : > { %2127 = dma.hbm_to_vmem [thread:$0]  (!%p2767_p5), %s579_s10, 512, %s581_s24, [#allocation6], %s2609_s5, %s2609_s5, %s2610_s26  }
  0x2e   : > { %s604_s4 = sshll.u32 %s3082_s14, 4  ;;  %s606_s7 = sshll.u32 %s2614_s2, 4  ;;  %s605_s4 = int_to_ptr.hbm [resolvable:$true] %s604_s4  ;;  %s607_s7 = int_to_ptr.vmem [resolvable:$true] %s606_s7 }
  0x2f   : > { %2133 = dma.hbm_to_vmem [thread:$0]  (!%p2767_p5), %s605_s4, 512, %s607_s7, [#allocation9], %s2609_s5, %s2609_s5, %s2610_s26  }
  0x30   : > { %s2615_s14 = smov [#allocation13]   ;;  %s664_s10 = sshll.u32 %s3049_s12, 4  ;;  %s665_s10 = int_to_ptr.hbm [resolvable:$true] %s664_s10 }
  0x31   : > { %s632_s27 = sshll.u32 %s2615_s14, 4  ;;  %s2616_s1 = smov [#allocation16]   ;;  %s633_s27 = int_to_ptr.vmem [resolvable:$true] %s632_s27 }
  0x32   : > { %2139 = dma.hbm_to_vmem [thread:$0]  (!%p2767_p5), %s631_s3, 512, %s633_s27, [#allocation12], %s2609_s5, %s2609_s5, %s2610_s26  }
  0x33   : > { %s666_s4 = sshll.u32 %s2616_s1, 4  ;;  %s2617_s22 = smov [#allocation19]   ;;  %s667_s4 = int_to_ptr.vmem [resolvable:$true] %s666_s4 }
  0x34   : > { %2145 = dma.hbm_to_vmem [thread:$0]  (!%p2767_p5), %s665_s10, 512, %s667_s4, [#allocation15], %s2609_s5, %s2609_s5, %s2610_s26  }
  0x35   : > { %s700_s2 = sshll.u32 %s2617_s22, 4  ;;  %745 = sbr.rel (%p2753_p3) target bundleno = 2428 (0x97c), region = 108  ;;  %s701_s2 = int_to_ptr.vmem [resolvable:$true] %s700_s2 }
  0x36   : > { %2151 = dma.hbm_to_vmem [thread:$0]  (!%p2767_p5), %s699_s25, 512, %s701_s2, [#allocation18], %s2609_s5, %s2609_s5, %s2610_s26  }
  0x3a   : > { %2578 = dma.done.wait (%p2152_p2), [#allocation4], 512  }
  0x3b   : > { %2580 = vsyncadd (%p2152_p2), [#allocation4], 4294966784 }
  0x3c   : > { %2582 = dma.done.wait (%p2152_p2), [#allocation6], 528  }
  0x3d   : > { %2584 = vsyncadd (%p2152_p2), [#allocation6], 4294966768 }
  0x3e   : > { %2586 = dma.done.wait (%p2152_p2), [#allocation9], 528  }
  0x3f   : > { %2588 = vsyncadd (%p2152_p2), [#allocation9], 4294966768 }
  0x40   : > { %2590 = dma.done.wait (%p2152_p2), [#allocation12], 528  }
  0x41   : > { %2592 = vsyncadd (%p2152_p2), [#allocation12], 4294966768 }
  0x42   : > { %2594 = dma.done.wait (%p2152_p2), [#allocation15], 1024  }
  0x43   : > { %2596 = vsyncadd (%p2152_p2), [#allocation15], 4294966272 }
  0x44   : > { %2598 = dma.done.wait (%p2152_p2), [#allocation18], 1024  }
  0x45   : > { %2600 = vsyncadd (%p2152_p2), [#allocation18], 4294966272  ;;  %p860_p6 = scmp.lt.s32.totalorder %s2748_s0, 1  ;;  %v909_v0 = vld [vmem:[#allocation7 + $0x18] sm:$0xff]  ;;  %v908_v2 = vld [vmem:[#allocation7 + $0x10] sm:$0xff]  ;;  %s3083_s26 = sld [smem:[#allocation27_spill]] }
  0x46   : > { %v877_v1 = vld [vmem:[#allocation3 + $0x18] sm:$0xff]  ;;  %926 = vmatpush.msra.mxu1 %v909_v0  ;;  %v876_v3 = vld [vmem:[#allocation3 + $0x10] sm:$0xff]  ;;  %v875_v5 = vld [vmem:[#allocation3 + $0x8] sm:$0xff]  ;;  %vm882_vm0 = vcmask 261120   ;;  %vm963_vm1 = vcmask 64512   ;;  %s2619_s7 = smov 120  }
  0x47   : > { %s3088_s0 = smov (!%p860_p6, %s2748_s0), 1  ;;  %898 = vmatpush.msra.mxu0 %v877_v1  ;;  %v907_v4 = vld [vmem:[#allocation7 + $0x8] sm:$0xff]  ;;  %v906_v6 = vld [vmem:[#allocation7] sm:$0xff]  ;;  %v2202_v10 = vld [vmem:[#allocation5] ss:$0 sm:$0xff]  ;;  %s2620_s14 = smov 112  }
  0x48   : > { %s2869_s23 = sshll.u32 %s3088_s0, 3  ;;  %v874_v7 = vld [vmem:[#allocation3] sm:$0xff]  ;;  %927 = vmatpush.msra.mxu1 %v908_v2  ;;  %s2618_s0 = smov 104   ;;  %v936_v17 = vld [vmem:[#allocation10 + $0x10] sm:$0xff]  ;;  %v935_v18 = vld [vmem:[#allocation10 + $0x8] sm:$0xff] }
  0x49   : > { %899 = vmatpush.msra.mxu0 %v876_v3  ;;  %v2201_v9 = vld [vmem:[#allocation8] ss:$0 sm:$0xff]  ;;  %v934_v19 = vld [vmem:[#allocation10] sm:$0xff]  ;;  %s2621_s27 = smov 8   ;;  %s2622_s30 = smov 16  }
  0x4a   : > { %928 = vmatpush.msra.mxu1 %v907_v4  ;;  %v937_v16 = vld [vmem:[#allocation10 + $0x18] sm:$0xff]  ;;  %v2203_v28 = vld [vmem:[#allocation11] ss:$0 sm:$0xff]  ;;  %s2623_s28 = smov 24   ;;  %s3084_s6 = sld [smem:[#allocation28_spill]] }
  0x4b   : > { %s863_s3 = scalar_lea.vmem %s3083_s26, %s2869_s23  ;;  %900 = vmatpush.msra.mxu0 %v875_v5  ;;  %954 = vmatpush.msra.mxu2 %v937_v16 }
  0x4c   : > { %v2875_v8 = vld [vmem:[%s863_s3] sm:$0xff]  ;;  %929 = vmatpush.msra.mxu1 %v906_v6 }
  0x4d   : > { %901 = vmatpush.msra.mxu0 %v874_v7  ;;  %2039 = vmatmul.msk.f32.vlgmr.msra.gmra.mxu1 %vm882_vm0, %v2875_v8 }
  0x4e   : > { %2038 = vmatmul.msk.f32.vlgmr.msra.gmra.mxu0 %vm882_vm0, %v2875_v8  ;;  %955 = vmatpush.msra.mxu2 %v936_v17 }
  0x50   : > { %956 = vmatpush.msra.mxu2 %v935_v18  ;;  %s867_s25 = scalar_lea.vmem %s3084_s6, %s2869_s23 }
  0x52   : > { %957 = vmatpush.msra.mxu2 %v934_v19 }
  0x53   : > { %2040 = vmatmul.msk.f32.vlgmr.msra.gmra.mxu2 %vm882_vm0, %v2875_v8 }
  0xca   : > { %v931_v11 = vpop.f32.mrf.mxu1 }
  0xcb   : > { %v903_v12 = vpop.f32.mrf.mxu0  ;;  %v932_v13 = vadd.f32 %v2201_v9, %v931_v11 }
  0xcc   : > { %v904_v14 = vadd.f32 %v2202_v10, %v903_v12 }
  0xcd   : > { %1209 = vrot.lane.b32.xlu2 %v932_v13, %s2618_s0  ;;  %1040 = vrot.lane.b32.xlu1 %v932_v13, %s2619_s7 }
  0xce   : > { %v962_v15 = vmul.f32 0.35355338, %v904_v14  ;;  %1125 = vrot.lane.b32.xlu0 %v932_v13, %s2620_s14  ;;  %2041 = vmatpush.xpose.msk.msra.mxu3 %vm963_vm1, %v932_v13 }
  0xd1   : > { %2042 = vmatmul.msk.f32.vlgmr.msra.gmra.mxu3 %vm963_vm1, %v962_v15 }
  0xd5   : > { %1207 = vrot.lane.b32.xlu2 %v962_v15, %s2618_s0  ;;  %1038 = vrot.lane.b32.xlu1 %v962_v15, %s2619_s7 }
  0xd6   : > { %1123 = vrot.lane.b32.xlu0 %v962_v15, %s2620_s14  ;;  %v959_v29 = vpop.f32.mrf.mxu2 }
  0xd7   : > { %v960_v30 = vadd.f32 %v2203_v28, %v959_v29 }
  0xd9   : > { %1032 = vmatpush.msrb.mxu3 %v960_v30 }
 0x127   : > { %v1210_v21 = vpop.permute.xlu2 %1209 }
 0x12f   : > { %v1208_v25 = vpop.permute.xlu2 %1207 }
 0x13f   : > { %v1041_v20 = vpop.permute.xlu1 %1040 }
 0x140   : > { %v1126_v22 = vpop.permute.xlu0 %1125  ;;  %2044 = vmatpush.xpose.msk.msrb.mxu0 %vm963_vm1, %v1041_v20 }
 0x141   : > { %2047 = vmatpush.xpose.msk.msrb.mxu2 %vm963_vm1, %v1126_v22 }
 0x144   : > { %2050 = vmatpush.xpose.msk.msra.mxu0 %vm963_vm1, %v1210_v21 }
 0x147   : > { %v1039_v23 = vpop.permute.xlu1 %1038 }
 0x148   : > { %v1124_v24 = vpop.permute.xlu0 %1123  ;;  %2045 = vmatmul.msk.f32.vlgmr.msrb.gmra.mxu0 %vm963_vm1, %v1039_v23 }
 0x149   : > { %2048 = vmatmul.msk.f32.vlgmr.msrb.gmra.mxu2 %vm963_vm1, %v1124_v24 }
 0x150   : > { %2051 = vmatmul.msk.f32.vlgmr.msra.gmra.mxu0 %vm963_vm1, %v1208_v25 }
 0x154   : > { %v987_v26 = vpop.f32.mrf.mxu3 }
 0x155   : > { %v990_v27 = vsel %vm963_vm1, %v987_v26, -inf }
 0x156   : > { %991 = vmax.xlane.f32.xlu0 %v990_v27 }
 0x1c5   : > { %v1063_v31 = vpop.f32.mrf.mxu0 }
 0x1c6   : > { %v1066_v32 = vsel %vm963_vm1, %v1063_v31, -inf }
 0x1c7   : > { %1067 = vmax.xlane.f32.xlu1 %v1066_v32 }
 0x1c9   : > { %v992_v33 = vpop.xlane.xlu0 %991 }
 0x1ca   : > { %v993_v34 = vsub.f32 %v987_v26, %v992_v33 }
 0x1cc   : > { %v994_v35 = vmul.f32 1.442695, %v993_v34  ;;  %v1148_v36 = vpop.f32.mrf.mxu2 }
 0x1cd   : > { %v1151_v37 = vsel %vm963_vm1, %v1148_v36, -inf  ;;  %v1232_v38 = vpop.f32.mrf.mxu0 }
 0x1ce   : > { %2211 = vpow2.f32 %v994_v35  ;;  %1152 = vmax.xlane.f32.xlu2 %v1151_v37  ;;  %v1235_v40 = vsel %vm963_vm1, %v1232_v38, -inf }
 0x1d4   : > { %v2212_v39 = vpop.eup %2211 }
 0x1d5   : > { %v996_v41 = vsel %vm963_vm1, %v2212_v39, 0.0 }
 0x1d6   : > { %1236 = vmax.xlane.f32.xlu2 %v1235_v40  ;;  %997 = vadd.xlane.f32.xlu0 %v996_v41 }
 0x23a   : > { %v1068_v42 = vpop.xlane.xlu1 %1067 }
 0x23b   : > { %v1069_v43 = vsub.f32 %v1063_v31, %v1068_v42 }
 0x23d   : > { %v1070_v44 = vmul.f32 1.442695, %v1069_v43 }
 0x23f   : > { %2213 = vpow2.f32 %v1070_v44 }
 0x241   : > { %v1153_v45 = vpop.xlane.xlu2 %1152 }
 0x242   : > { %v1154_v46 = vsub.f32 %v1148_v36, %v1153_v45 }
 0x244   : > { %v1155_v47 = vmul.f32 1.442695, %v1154_v46 }
 0x245   : > { %v2902_v48 = vpop.eup %2213 }
 0x246   : > { %2215 = vpow2.f32 %v1155_v47  ;;  %v1072_v49 = vsel %vm963_vm1, %v2902_v48, 0.0 }
 0x247   : > { %1073 = vadd.xlane.f32.xlu1 %v1072_v49  ;;  %v1295_v49 = vld [vmem:[#allocation13 + $0x18] sm:$0xff] }
 0x248   : > { %1315 = vmatpush.msra.mxu2 %v1295_v49 }
 0x249   : > { %v1237_v50 = vpop.xlane.xlu2 %1236  ;;  %v998_v51 = vpop.xlane.xlu0 %997 }
 0x24a   : > { %v1238_v52 = vsub.f32 %v1232_v38, %v1237_v50  ;;  %2217 = vrcp.f32 %v998_v51  ;;  %v1010_v60 = vand.u32 2147483648, %v998_v51  ;;  %v1008_v62 = vand.u32 2147483647, %v998_v51  ;;  %v1294_v50 = vld [vmem:[#allocation13 + $0x10] sm:$0xff] }
 0x24b   : > { %vm1004_vm3 = vweird.f32 %v998_v51  ;;  %1316 = vmatpush.msra.mxu2 %v1294_v50 }
 0x24c   : > { %v2906_v53 = vpop.eup %2215  ;;  %v1239_v54 = vmul.f32 1.442695, %v1238_v52  ;;  %v1011_v1 = vor.u32 1.1754944e-38, %v1010_v60  ;;  %vm1009_vm5 = vcmp.eq.f32.partialorder %v1008_v62, 8.507059e+37  ;;  %v1292_v52 = vld [vmem:[#allocation13] sm:$0xff]  ;;  %v1357_v60 = vld [vmem:[#allocation16 + $0x10] sm:$0xff] }
 0x24d   : > { %v1157_v55 = vsel %vm963_vm1, %v2906_v53, 0.0  ;;  %v1356_v62 = vld [vmem:[#allocation16 + $0x8] sm:$0xff] }
 0x24e   : > { %2219 = vpow2.f32 %v1239_v54  ;;  %1158 = vadd.xlane.f32.xlu2 %v1157_v55  ;;  %v1358_v54 = vld [vmem:[#allocation16 + $0x18] sm:$0xff] }
 0x24f   : > { %1378 = vmatpush.msrb.mxu0 %v1358_v54 }
 0x250   : > { %v2218_v56 = vpop.eup %2217 }
 0x251   : > { %v1000_v57 = vmul.f32 %v2218_v56, %v998_v51  ;;  %vm1005_vm2 = vweird.f32 %v2218_v56  ;;  %v1293_v51 = vld [vmem:[#allocation13 + $0x8] sm:$0xff]  ;;  %1379 = vmatpush.msrb.mxu0 %v1357_v60 }
 0x252   : > { %vm1006_vm4 = vmor %vm1004_vm3, %vm1005_vm2  ;;  %1317 = vmatpush.msra.mxu2 %v1293_v51 }
 0x253   : > { %v1001_v58 = vsub.f32 1.0, %v1000_v57  ;;  %1380 = vmatpush.msrb.mxu0 %v1356_v62 }
 0x254   : > { %v2910_v59 = vpop.eup %2219  ;;  %1318 = vmatpush.msra.mxu2 %v1292_v52 }
 0x255   : > { %v1002_v61 = vmul.f32 %v2218_v56, %v1001_v58  ;;  %v1241_v63 = vsel %vm963_vm1, %v2910_v59, 0.0 }
 0x256   : > { %1242 = vadd.xlane.f32.xlu0 %v1241_v63  ;;  %v1324_v63 = vld [vmem:[#allocation14] sm:$0xff] }
 0x257   : > { %v1003_v0 = vadd.f32 %v2218_v56, %v1002_v61  ;;  %v1325_v61 = vld [vmem:[#allocation14 + $0x8] sm:$0xff] }
 0x259   : > { %v1007_v2 = vsel %vm1006_vm4, %v2218_v56, %v1003_v0  ;;  %vm1121_vm4 = vcmask 130112   ;;  %v1355_v0 = vld [vmem:[#allocation16] sm:$0xff] }
 0x25a   : > { %v1012_v3 = vsel %vm1009_vm5, %v1011_v1, %v1007_v2  ;;  %vm1205_vm5 = vcmask 195712   ;;  %1381 = vmatpush.msrb.mxu0 %v1355_v0  ;;  %v873_v1 = vld [vmem:[%s867_s25] sm:$0xff] }
 0x25b   : > { %v1013_v4 = vmul.f32 %v2212_v39, %v1012_v3  ;;  %2055 = vmatmul.msk.f32.vlgmr.msrb.gmra.mxu0 %vm882_vm0, %v873_v1  ;;  %v2204_v2 = vld [vmem:[%s3046_s9] ss:$0 sm:$0xff] }
 0x25d   : > { %2043 = vmatmul.msk.f32.vlgmr.msrb.gmra.mxu3 %vm963_vm1, %v1013_v4 }
 0x260   : > { %1091 = vrot.lane.b32.xlu1 %v960_v30, %s2619_s7 }
 0x266   : > { %1175 = vrot.lane.b32.xlu2 %v960_v30, %s2620_s14 }
 0x26a   : > { %1259 = vrot.lane.b32.xlu0 %v960_v30, %s2618_s0 }
 0x2ba   : > { %v1074_v5 = vpop.xlane.xlu1 %1073 }
 0x2bb   : > { %2221 = vrcp.f32 %v1074_v5  ;;  %v1086_v14 = vand.u32 2147483648, %v1074_v5  ;;  %vm1080_vm7 = vweird.f32 %v1074_v5  ;;  %v1084_v18 = vand.u32 2147483647, %v1074_v5 }
 0x2bd   : > { %v1087_v22 = vor.u32 1.1754944e-38, %v1086_v14  ;;  %vm1085_vm10 = vcmp.eq.f32.partialorder %v1084_v18, 8.507059e+37 }
 0x2c1   : > { %v2222_v6 = vpop.eup %2221  ;;  %v1159_v7 = vpop.xlane.xlu2 %1158 }
 0x2c2   : > { %v1076_v9 = vmul.f32 %v2222_v6, %v1074_v5  ;;  %2223 = vrcp.f32 %v1159_v7  ;;  %vm1081_vm6 = vweird.f32 %v2222_v6  ;;  %v1171_v20 = vand.u32 2147483648, %v1159_v7 }
 0x2c3   : > { %vm1082_vm8 = vmor %vm1080_vm7, %vm1081_vm6  ;;  %v1169_v24 = vand.u32 2147483647, %v1159_v7  ;;  %vm1165_vm11 = vweird.f32 %v1159_v7  ;;  %vm1289_vm6 = vcmask 261312  }
 0x2c4   : > { %v1077_v10 = vsub.f32 1.0, %v1076_v9  ;;  %v1172_v28 = vor.u32 1.1754944e-38, %v1171_v20 }
 0x2c5   : > { %vm1170_vm13 = vcmp.eq.f32.partialorder %v1169_v24, 8.507059e+37  ;;  %v1386_v24 = vld [vmem:[#allocation17] sm:$0xff] }
 0x2c6   : > { %v1078_v11 = vmul.f32 %v2222_v6, %v1077_v10 }
 0x2c8   : > { %v2224_v12 = vpop.eup %2223  ;;  %v1079_v13 = vadd.f32 %v2222_v6, %v1078_v11 }
 0x2c9   : > { %v1161_v15 = vmul.f32 %v2224_v12, %v1159_v7  ;;  %v1176_v16 = vpop.permute.xlu2 %1175  ;;  %v1243_v17 = vpop.xlane.xlu0 %1242  ;;  %vm1166_vm9 = vweird.f32 %v2224_v12 }
 0x2ca   : > { %2225 = vrcp.f32 %v1243_v17  ;;  %1196 = vmatpush.msra.mxu3 %v1176_v16  ;;  %v1083_v21 = vsel %vm1082_vm8, %v2222_v6, %v1079_v13  ;;  %vm1167_vm12 = vmor %vm1165_vm11, %vm1166_vm9  ;;  %v1255_v36 = vand.u32 2147483648, %v1243_v17  ;;  %v1253_v38 = vand.u32 2147483647, %v1243_v17  ;;  %v2205_v6 = vld [vmem:[%s3050_s13] ss:$0 sm:$0xff] }
 0x2cb   : > { %v1162_v19 = vsub.f32 1.0, %v1161_v15  ;;  %v1088_v26 = vsel %vm1085_vm10, %v1087_v22, %v1083_v21  ;;  %vm1249_vm15 = vweird.f32 %v1243_v17  ;;  %v1389_v21 = vld [vmem:[#allocation17 + $0x18] sm:$0xff]  ;;  %v1388_v22 = vld [vmem:[#allocation17 + $0x10] sm:$0xff] }
 0x2cc   : > { %v1089_v33 = vmul.f32 %v2902_v48, %v1088_v26  ;;  %v1256_v40 = vor.u32 1.1754944e-38, %v1255_v36  ;;  %vm1254_vm3 = vcmp.eq.f32.partialorder %v1253_v38, 8.507059e+37 }
 0x2cd   : > { %v1163_v23 = vmul.f32 %v2224_v12, %v1162_v19 }
 0x2cf   : > { %v1164_v25 = vadd.f32 %v2224_v12, %v1163_v23  ;;  %v1387_v23 = vld [vmem:[#allocation17 + $0x8] sm:$0xff] }
 0x2d0   : > { %v2226_v27 = vpop.eup %2225 }
 0x2d1   : > { %v1168_v29 = vsel %vm1167_vm12, %v2224_v12, %v1164_v25  ;;  %v1245_v30 = vmul.f32 %v2226_v27, %v1243_v17  ;;  %vm1250_vm14 = vweird.f32 %v2226_v27 }
 0x2d2   : > { %v1173_v31 = vsel %vm1170_vm13, %v1172_v28, %v1168_v29  ;;  %v1092_v32 = vpop.permute.xlu1 %1091  ;;  %vm1251_vm2 = vmor %vm1249_vm15, %vm1250_vm14 }
 0x2d3   : > { %v1246_v34 = vsub.f32 1.0, %v1245_v30  ;;  %1112 = vmatpush.msrb.mxu1 %v1092_v32  ;;  %v1174_v35 = vmul.f32 %v2906_v53, %v1173_v31  ;;  %v1327_v53 = vld [vmem:[#allocation14 + $0x18] sm:$0xff] }
 0x2d4   : > { %2046 = vmatmul.msk.f32.vlgmr.msrb.gmra.mxu1 %vm963_vm1, %v1089_v33  ;;  %1347 = vmatpush.msrb.mxu3 %v1327_v53 }
 0x2d5   : > { %v1247_v37 = vmul.f32 %v2226_v27, %v1246_v34  ;;  %2049 = vmatmul.msk.f32.vlgmr.msra.gmra.mxu3 %vm963_vm1, %v1174_v35 }
 0x2d7   : > { %v1248_v39 = vadd.f32 %v2226_v27, %v1247_v37 }
 0x2d8   : > { %v1383_v7 = vpop.f32.mrf.mxu0 }
 0x2d9   : > { %v1252_v41 = vsel %vm1251_vm2, %v2226_v27, %v1248_v39  ;;  %v1384_v9 = vadd.f32 %v2205_v6, %v1383_v7  ;;  %v2207_v39 = vld [vmem:[%s3052_s15] ss:$0 sm:$0xff] }
 0x2da   : > { %v1257_v42 = vsel %vm1254_vm3, %v1256_v40, %v1252_v41 }
 0x2db   : > { %v1258_v43 = vmul.f32 %v2910_v59, %v1257_v42  ;;  %v1326_v59 = vld [vmem:[#allocation14 + $0x10] sm:$0xff]  ;;  %2057 = vmatpush.xpose.msk.msrb.mxu2 %vm963_vm1, %v1384_v9 }
 0x2dc   : > { %v1260_v44 = vpop.permute.xlu0 %1259  ;;  %1348 = vmatpush.msrb.mxu3 %v1326_v59 }
 0x2dd   : > { %1280 = vmatpush.msra.mxu1 %v1260_v44 }
 0x2de   : > { %2052 = vmatmul.msk.f32.vlgmr.msra.gmra.mxu1 %vm963_vm1, %v1258_v43  ;;  %1349 = vmatpush.msrb.mxu3 %v1325_v61 }
 0x2df   : > { %1406 = vmatpush.msrb.mxu1 %v1389_v21 }
 0x2e0   : > { %v1034_v45 = vpop.f32.mrf.mxu3  ;;  %1350 = vmatpush.msrb.mxu3 %v1324_v63 }
 0x2e1   : > { %1037 = vst.msk [vmem:[#allocation2] sm:$0xff] %vm963_vm1, %v1034_v45  ;;  %1407 = vmatpush.msrb.mxu1 %v1388_v22 }
 0x2e3   : > { %1408 = vmatpush.msrb.mxu1 %v1387_v23 }
 0x2e5   : > { %1409 = vmatpush.msrb.mxu1 %v1386_v24 }
 0x2e6   : > { %2056 = vmatmul.msk.f32.vlgmr.msrb.gmra.mxu1 %vm882_vm0, %v873_v1 }
 0x351   : > { %v1114_v46 = vpop.f32.mrf.mxu1 }
 0x352   : > { %1118 = vrot.lane.b32.xlu1 %v1114_v46, %s2621_s27 }
 0x358   : > { %v1198_v47 = vpop.f32.mrf.mxu3 }
 0x359   : > { %1202 = vrot.lane.b32.xlu0 %v1198_v47, %s2622_s30 }
 0x35a   : > { %1575 = vrot.lane.b32.xlu1 %v1384_v9, %s2620_s14 }
 0x35b   : > { %v1282_v48 = vpop.f32.mrf.mxu1 }
 0x35c   : > { %1286 = vrot.lane.b32.xlu2 %v1282_v48, %s2623_s28 }
 0x363   : > { %v1411_v40 = vpop.f32.mrf.mxu1 }
 0x364   : > { %1491 = vrot.lane.b32.xlu2 %v1384_v9, %s2619_s7  ;;  %v1412_v41 = vadd.f32 %v2207_v39, %v1411_v40 }
 0x366   : > { %1483 = vmatpush.msra.mxu3 %v1412_v41 }
 0x3b6   : > { %v1287_v57 = vpop.permute.xlu2 %1286 }
 0x3be   : > { %v1492_v13 = vpop.permute.xlu2 %1491 }
 0x3bf   : > { %2060 = vmatpush.xpose.msk.msra.mxu0 %vm963_vm1, %v1492_v13 }
 0x3c4   : > { %v1119_v55 = vpop.permute.xlu1 %1118 }
 0x3c5   : > { %1122 = vst.msk [vmem:[#allocation2] sm:$0xff] %vm1121_vm4, %v1119_v55 }
 0x3cb   : > { %v1203_v56 = vpop.permute.xlu0 %1202 }
 0x3cc   : > { %1206 = vst.msk [vmem:[#allocation2] sm:$0xff] %vm1205_vm5, %v1203_v56  ;;  %v1576_v14 = vpop.permute.xlu1 %1575 }
 0x3cd   : > { %1290 = vst.msk [vmem:[#allocation2] sm:$0xff] %vm1289_vm6, %v1287_v57 }
 0x3d4   : > { %v1291_v58 = vld [vmem:[#allocation2] sm:$0xff] }
 0x3d5   : > { %2053 = vmatmul.msk.f32.vlgmr.msra.gmra.mxu2 %vm882_vm0, %v1291_v58 }
 0x3d6   : > { %2063 = vmatpush.xpose.msk.msra.mxu2 %vm963_vm1, %v1576_v14 }
 0x458   : > { %v1320_v3 = vpop.f32.mrf.mxu2 }
 0x459   : > { %v1321_v4 = vadd.f32 %v2204_v2, %v1320_v3 }
 0x45b   : > { %v2941_v5 = vadd.f32 %v1321_v4, %v2875_v8  ;;  %v2206_v8 = vld [vmem:[%s3048_s11] ss:$0 sm:$0xff] }
 0x45d   : > { %2054 = vmatmul.msk.f32.vlgmr.msrb.gmra.mxu3 %vm882_vm0, %v2941_v5 }
 0x4e0   : > { %v1352_v10 = vpop.f32.mrf.mxu3 }
 0x4e1   : > { %v1353_v11 = vadd.f32 %v2206_v8, %v1352_v10 }
 0x4e3   : > { %v1414_v12 = vmul.f32 0.35355338, %v1353_v11 }
 0x4e5   : > { %1656 = vrot.lane.b32.xlu2 %v1414_v12, %s2618_s0  ;;  %1489 = vrot.lane.b32.xlu1 %v1414_v12, %s2619_s7 }
 0x4e6   : > { %1573 = vrot.lane.b32.xlu0 %v1414_v12, %s2620_s14  ;;  %2058 = vmatmul.msk.f32.vlgmr.msrb.gmra.mxu2 %vm963_vm1, %v1414_v12 }
 0x4ee   : > { %1658 = vrot.lane.b32.xlu0 %v1384_v9, %s2618_s0 }
 0x53f   : > { %v1657_v18 = vpop.permute.xlu2 %1656 }
 0x557   : > { %v1490_v15 = vpop.permute.xlu1 %1489 }
 0x558   : > { %v1574_v16 = vpop.permute.xlu0 %1573  ;;  %2061 = vmatmul.msk.f32.vlgmr.msra.gmra.mxu0 %vm963_vm1, %v1490_v15 }
 0x559   : > { %2064 = vmatmul.msk.f32.vlgmr.msra.gmra.mxu2 %vm963_vm1, %v1574_v16 }
 0x560   : > { %v1659_v17 = vpop.permute.xlu0 %1658 }
 0x561   : > { %2066 = vmatpush.xpose.msk.msrb.mxu0 %vm963_vm1, %v1659_v17 }
 0x564   : > { %2067 = vmatmul.msk.f32.vlgmr.msrb.gmra.mxu0 %vm963_vm1, %v1657_v18 }
 0x569   : > { %v1438_v19 = vpop.f32.mrf.mxu2 }
 0x56a   : > { %v1441_v20 = vsel %vm963_vm1, %v1438_v19, -inf }
 0x56b   : > { %1442 = vmax.xlane.f32.xlu1 %v1441_v20 }
 0x5d5   : > { %v1514_v25 = vpop.f32.mrf.mxu0 }
 0x5d6   : > { %v1517_v26 = vsel %vm963_vm1, %v1514_v25, -inf }
 0x5d7   : > { %1518 = vmax.xlane.f32.xlu0 %v1517_v26 }
 0x5dc   : > { %v1598_v27 = vpop.f32.mrf.mxu2 }
 0x5dd   : > { %v1601_v28 = vsel %vm963_vm1, %v1598_v27, -inf }
 0x5de   : > { %1602 = vmax.xlane.f32.xlu2 %v1601_v28  ;;  %v1443_v29 = vpop.xlane.xlu1 %1442 }
 0x5df   : > { %v1444_v30 = vsub.f32 %v1438_v19, %v1443_v29 }
 0x5e1   : > { %v1445_v31 = vmul.f32 1.442695, %v1444_v30  ;;  %v1681_v32 = vpop.f32.mrf.mxu0 }
 0x5e2   : > { %v1684_v33 = vsel %vm963_vm1, %v1681_v32, -inf }
 0x5e3   : > { %2227 = vpow2.f32 %v1445_v31  ;;  %1685 = vmax.xlane.f32.xlu1 %v1684_v33 }
 0x5e9   : > { %v2228_v34 = vpop.eup %2227 }
 0x5ea   : > { %v1447_v35 = vsel %vm963_vm1, %v2228_v34, 0.0 }
 0x5eb   : > { %1448 = vadd.xlane.f32.xlu0 %v1447_v35 }
 0x64a   : > { %v1519_v36 = vpop.xlane.xlu0 %1518 }
 0x64b   : > { %v1520_v37 = vsub.f32 %v1514_v25, %v1519_v36 }
 0x64d   : > { %v1521_v38 = vmul.f32 1.442695, %v1520_v37 }
 0x64f   : > { %2229 = vpow2.f32 %v1521_v38 }
 0x651   : > { %v1603_v42 = vpop.xlane.xlu2 %1602 }
 0x652   : > { %v1604_v43 = vsub.f32 %v1598_v27, %v1603_v42 }
 0x654   : > { %v1605_v44 = vmul.f32 1.442695, %v1604_v43 }
 0x655   : > { %v2230_v45 = vpop.eup %2229 }
 0x656   : > { %2231 = vpow2.f32 %v1605_v44  ;;  %v1686_v46 = vpop.xlane.xlu1 %1685  ;;  %v1523_v47 = vsel %vm963_vm1, %v2230_v45, 0.0 }
 0x657   : > { %v1687_v48 = vsub.f32 %v1681_v32, %v1686_v46  ;;  %1524 = vadd.xlane.f32.xlu2 %v1523_v47  ;;  %v1743_v47 = vld [vmem:[#allocation19 + $0x18] sm:$0xff] }
 0x658   : > { %1763 = vmatpush.msrb.mxu2 %v1743_v47 }
 0x659   : > { %v1688_v49 = vmul.f32 1.442695, %v1687_v48  ;;  %v1742_v48 = vld [vmem:[#allocation19 + $0x10] sm:$0xff] }
 0x65a   : > { %1764 = vmatpush.msrb.mxu2 %v1742_v48 }
 0x65b   : > { %2233 = vpow2.f32 %v1688_v49  ;;  %v1741_v49 = vld [vmem:[#allocation19 + $0x8] sm:$0xff] }
 0x65c   : > { %v2975_v50 = vpop.eup %2231  ;;  %1765 = vmatpush.msrb.mxu2 %v1741_v49 }
 0x65d   : > { %v1607_v51 = vsel %vm963_vm1, %v2975_v50, 0.0 }
 0x65e   : > { %1608 = vadd.xlane.f32.xlu1 %v1607_v51  ;;  %v1449_v52 = vpop.xlane.xlu0 %1448  ;;  %v1775_v51 = vld [vmem:[%s3055_s18 + $0x18] sm:$0xff] }
 0x65f   : > { %2235 = vrcp.f32 %v1449_v52  ;;  %v1461_v58 = vand.u32 2147483648, %v1449_v52  ;;  %v1459_v60 = vand.u32 2147483647, %v1449_v52  ;;  %vm1455_vm8 = vweird.f32 %v1449_v52 }
 0x661   : > { %v2979_v53 = vpop.eup %2233  ;;  %v1462_v62 = vor.u32 1.1754944e-38, %v1461_v58  ;;  %vm1460_vm10 = vcmp.eq.f32.partialorder %v1459_v60, 8.507059e+37  ;;  %v2208_v58 = vld [vmem:[%s3054_s17] ss:$0 sm:$0xff] }
 0x662   : > { %v1690_v54 = vsel %vm963_vm1, %v2979_v53, 0.0 }
 0x663   : > { %1691 = vadd.xlane.f32.xlu0 %v1690_v54 }
 0x665   : > { %v2236_v55 = vpop.eup %2235 }
 0x666   : > { %v1451_v56 = vmul.f32 %v2236_v55, %v1449_v52  ;;  %vm1456_vm7 = vweird.f32 %v2236_v55 }
 0x667   : > { %vm1457_vm9 = vmor %vm1455_vm8, %vm1456_vm7 }
 0x668   : > { %v1452_v57 = vsub.f32 1.0, %v1451_v56  ;;  %v1773_v56 = vld [vmem:[%s3055_s18 + $0x8] sm:$0xff] }
 0x66a   : > { %v1453_v59 = vmul.f32 %v2236_v55, %v1452_v57  ;;  %v1772_v57 = vld [vmem:[%s3055_s18] sm:$0xff] }
 0x66c   : > { %v1454_v61 = vadd.f32 %v2236_v55, %v1453_v59 }
 0x66e   : > { %v1458_v63 = vsel %vm1457_vm9, %v2236_v55, %v1454_v61  ;;  %v1774_v55 = vld [vmem:[%s3055_s18 + $0x10] sm:$0xff] }
 0x66f   : > { %v1463_v0 = vsel %vm1460_vm10, %v1462_v62, %v1458_v63  ;;  %1542 = vrot.lane.b32.xlu2 %v1412_v41, %s2619_s7  ;;  %v1804_v62 = vld [vmem:[%s3057_s20 + $0x8] sm:$0xff]  ;;  %v1803_v63 = vld [vmem:[%s3057_s20] sm:$0xff] }
 0x670   : > { %v1464_v1 = vmul.f32 %v2228_v34, %v1463_v0  ;;  %1823 = vmatpush.msra.mxu0 %v1804_v62  ;;  %v2209_v0 = vld [vmem:[%s3056_s19] ss:$0 sm:$0xff] }
 0x672   : > { %2059 = vmatmul.msk.f32.vlgmr.msra.gmra.mxu3 %vm963_vm1, %v1464_v1  ;;  %1824 = vmatpush.msra.mxu0 %v1803_v63 }
 0x677   : > { %1625 = vrot.lane.b32.xlu1 %v1412_v41, %s2620_s14  ;;  %1708 = vrot.lane.b32.xlu0 %v1412_v41, %s2618_s0  ;;  %s3085_s14 = sld [smem:[#allocation37_spill]] }
 0x6ca   : > { %v1525_v2 = vpop.xlane.xlu2 %1524 }
 0x6cb   : > { %2237 = vrcp.f32 %v1525_v2  ;;  %v1537_v8 = vand.u32 2147483648, %v1525_v2  ;;  %v1535_v11 = vand.u32 2147483647, %v1525_v2  ;;  %vm1531_vm12 = vweird.f32 %v1525_v2 }
 0x6cd   : > { %v1538_v15 = vor.u32 1.1754944e-38, %v1537_v8  ;;  %vm1536_vm14 = vcmp.eq.f32.partialorder %v1535_v11, 8.507059e+37 }
 0x6d1   : > { %v2238_v3 = vpop.eup %2237  ;;  %v1609_v4 = vpop.xlane.xlu1 %1608 }
 0x6d2   : > { %v1527_v6 = vmul.f32 %v2238_v3, %v1525_v2  ;;  %2239 = vrcp.f32 %v1609_v4  ;;  %v1543_v7 = vpop.permute.xlu2 %1542  ;;  %vm1532_vm11 = vweird.f32 %v2238_v3  ;;  %v1621_v25 = vand.u32 2147483648, %v1609_v4 }
 0x6d3   : > { %1563 = vmatpush.msra.mxu1 %v1543_v7  ;;  %vm1533_vm13 = vmor %vm1531_vm12, %vm1532_vm11  ;;  %vm1615_vm2 = vweird.f32 %v1609_v4  ;;  %v1619_v27 = vand.u32 2147483647, %v1609_v4 }
 0x6d4   : > { %v1528_v9 = vsub.f32 1.0, %v1527_v6  ;;  %v1622_v32 = vor.u32 1.1754944e-38, %v1621_v25 }
 0x6d5   : > { %vm1620_vm9 = vcmp.eq.f32.partialorder %v1619_v27, 8.507059e+37 }
 0x6d6   : > { %v1529_v10 = vmul.f32 %v2238_v3, %v1528_v9  ;;  %v1692_v12 = vpop.xlane.xlu0 %1691 }
 0x6d7   : > { %2241 = vrcp.f32 %v1692_v12  ;;  %v1704_v28 = vand.u32 2147483648, %v1692_v12  ;;  %v1702_v30 = vand.u32 2147483647, %v1692_v12  ;;  %vm1698_vm8 = vweird.f32 %v1692_v12 }
 0x6d8   : > { %v2240_v13 = vpop.eup %2239  ;;  %v1530_v14 = vadd.f32 %v2238_v3, %v1529_v10 }
 0x6d9   : > { %v1611_v16 = vmul.f32 %v2240_v13, %v1609_v4  ;;  %vm1616_vm15 = vweird.f32 %v2240_v13  ;;  %v1705_v34 = vor.u32 1.1754944e-38, %v1704_v28  ;;  %vm1703_vm11 = vcmp.eq.f32.partialorder %v1702_v30, 8.507059e+37 }
 0x6da   : > { %v1534_v17 = vsel %vm1533_vm13, %v2238_v3, %v1530_v14  ;;  %vm1617_vm3 = vmor %vm1615_vm2, %vm1616_vm15 }
 0x6db   : > { %v1539_v18 = vsel %vm1536_vm14, %v1538_v15, %v1534_v17  ;;  %v1612_v19 = vsub.f32 1.0, %v1611_v16 }
 0x6dc   : > { %v1540_v20 = vmul.f32 %v2230_v45, %v1539_v18 }
 0x6dd   : > { %v2242_v21 = vpop.eup %2241  ;;  %v1613_v22 = vmul.f32 %v2240_v13, %v1612_v19 }
 0x6de   : > { %v1694_v23 = vmul.f32 %v2242_v21, %v1692_v12  ;;  %2062 = vmatmul.msk.f32.vlgmr.msra.gmra.mxu1 %vm963_vm1, %v1540_v20  ;;  %vm1699_vm7 = vweird.f32 %v2242_v21 }
 0x6df   : > { %v1614_v24 = vadd.f32 %v2240_v13, %v1613_v22  ;;  %vm1700_vm10 = vmor %vm1698_vm8, %vm1699_vm7 }
 0x6e0   : > { %v1695_v26 = vsub.f32 1.0, %v1694_v23 }
 0x6e1   : > { %v1618_v31 = vsel %vm1617_vm3, %v2240_v13, %v1614_v24 }
 0x6e2   : > { %v1696_v29 = vmul.f32 %v2242_v21, %v1695_v26  ;;  %v1623_v35 = vsel %vm1620_vm9, %v1622_v32, %v1618_v31 }
 0x6e3   : > { %v1624_v41 = vmul.f32 %v2975_v50, %v1623_v35  ;;  %v1740_v50 = vld [vmem:[#allocation19] sm:$0xff] }
 0x6e4   : > { %v1697_v33 = vadd.f32 %v2242_v21, %v1696_v29  ;;  %1766 = vmatpush.msrb.mxu2 %v1740_v50 }
 0x6e6   : > { %v1701_v36 = vsel %vm1700_vm10, %v2242_v21, %v1697_v33 }
 0x6e7   : > { %v1706_v37 = vsel %vm1703_vm11, %v1705_v34, %v1701_v36 }
 0x6e8   : > { %v1707_v38 = vmul.f32 %v2979_v53, %v1706_v37 }
 0x6e9   : > { %v1709_v39 = vpop.permute.xlu0 %1708  ;;  %v1626_v40 = vpop.permute.xlu1 %1625 }
 0x6ea   : > { %1646 = vmatpush.msrb.mxu3 %v1626_v40  ;;  %1729 = vmatpush.msrb.mxu1 %v1709_v39 }
 0x6eb   : > { %2065 = vmatmul.msk.f32.vlgmr.msrb.gmra.mxu3 %vm963_vm1, %v1624_v41  ;;  %2068 = vmatmul.msk.f32.vlgmr.msrb.gmra.mxu1 %vm963_vm1, %v1707_v38 }
 0x6ec   : > { %1795 = vmatpush.msra.mxu3 %v1775_v51 }
 0x6ee   : > { %1796 = vmatpush.msra.mxu3 %v1774_v55 }
 0x6f0   : > { %1797 = vmatpush.msra.mxu3 %v1773_v56 }
 0x6f2   : > { %1798 = vmatpush.msra.mxu3 %v1772_v57 }
 0x6f5   : > { %v1485_v42 = vpop.f32.mrf.mxu3 }
 0x6f6   : > { %1488 = vst.msk [vmem:[#allocation2] sm:$0xff] %vm963_vm1, %v1485_v42  ;;  %vm1805_vm1 = vcmask 130048  }
 0x75b   : > { %v1565_v43 = vpop.f32.mrf.mxu1 }
 0x75c   : > { %1569 = vrot.lane.b32.xlu2 %v1565_v43, %s2621_s27  ;;  %s871_s27 = scalar_lea.vmem %s3085_s14, %s2869_s23 }
 0x768   : > { %v1731_v44 = vpop.f32.mrf.mxu1 }
 0x769   : > { %1735 = vrot.lane.b32.xlu1 %v1731_v44, %s2623_s28 }
 0x76e   : > { %v1648_v45 = vpop.f32.mrf.mxu3 }
 0x76f   : > { %1652 = vrot.lane.b32.xlu0 %v1648_v45, %s2622_s30 }
 0x7b6   : > { %v1570_v46 = vpop.permute.xlu2 %1569 }
 0x7b7   : > { %1572 = vst.msk [vmem:[#allocation2] sm:$0xff] %vm1121_vm4, %v1570_v46 }
 0x7db   : > { %v1736_v53 = vpop.permute.xlu1 %1735 }
 0x7e1   : > { %v1653_v52 = vpop.permute.xlu0 %1652 }
 0x7e2   : > { %1655 = vst.msk [vmem:[#allocation2] sm:$0xff] %vm1205_vm5, %v1653_v52 }
 0x7e3   : > { %1738 = vst.msk [vmem:[#allocation2] sm:$0xff] %vm1289_vm6, %v1736_v53 }
 0x7ea   : > { %v1739_v54 = vld [vmem:[#allocation2] sm:$0xff] }
 0x7eb   : > { %2069 = vmatmul.msk.f32.vlgmr.msrb.gmra.mxu2 %vm882_vm0, %v1739_v54 }
 0x86e   : > { %v1768_v59 = vpop.f32.mrf.mxu2 }
 0x86f   : > { %v1769_v60 = vadd.f32 %v2208_v58, %v1768_v59 }
 0x871   : > { %v1771_v61 = vadd.f32 %v1769_v60, %v2941_v5  ;;  %v2210_v5 = vld [vmem:[%s3058_s21] ss:$0 sm:$0xff] }
 0x873   : > { %2070 = vmatmul.msk.f32.vlgmr.msra.gmra.mxu3 %vm882_vm0, %v1771_v61 }
 0x8f6   : > { %v1800_v1 = vpop.f32.mrf.mxu3 }
 0x8f7   : > { %v1801_v2 = vadd.f32 %v2209_v0, %v1800_v1 }
 0x8f9   : > { %2071 = vmatmul.msk.f32.vlgmr.msra.gmra.mxu0 %vm1805_vm1, %v1801_v2 }
 0x976   : > { %v1826_v3 = vpop.f32.mrf.mxu0 }
 0x977   : > { %v1829_v4 = vadd.f32 %v1826_v3, %v1771_v61 }
 0x979   : > { %v1834_v6 = vadd.f32 %v2210_v5, %v1829_v4 }
 0x97b   : > { %1835 = vst.msk [vmem:[%s871_s27] sm:$0xff] %vm882_vm0, %v1834_v6 }
 0x97c PF: > { %s3086_s30 = sld [smem:[#allocation26_spill]] }
 0x982   : > { %s38_s3 = sadd.s32 1, %s3086_s30  }
 0x983   : > { %p35_p7 = scmp.ge.s32.totalorder %s38_s3, 4  }
 0x985   :  { %37 = sbr.rel (!%p35_p7) target bundleno = 18 (0x12), region = 186 }
 0x98a   :  { %1855 = vsyncpa [#allocation4], 1 }
 0x98b   :  { %1857 = vsyncpa [#allocation4 + $0x1], 1 }
 0x98c   :  { %1858 = vsyncpa [#allocation6], 1 }
 0x98d   :  { %1859 = vsyncpa [#allocation9], 1 }
 0x98e   :  { %1860 = vsyncpa [#allocation12], 1 }
 0x98f   :  { %1861 = vsyncpa [#allocation15], 1 }
 0x990   :  { %1862 = vsyncpa [#allocation18], 1 }

</bundles_post_ra>
